<compile_context>
chip_gen: v5e
topology: v5e:2x2
jax: 0.10.0
libtpu: 0.0.40
codegen_flags: <defaults>
</compile_context>

<pallas_src>
import jax
import jax.numpy as jnp
from jax import lax
from jax.experimental import pallas as pl
from jax.experimental.pallas import tpu as pltpu

_LANE = 128


def _round_up(x, m):
    return ((x + m - 1) // m) * m


# --------------------------------- kernels ---------------------------------

def _attend(adj_ref, z_src, el, er):
    """Masked-softmax attention aggregation for one head, one dst-row tile.

    adj_ref: (T, Np) int8 Ref   adjacency tile, adj[dst, src] in {0, 1}
    z_src:   (Np, F) bf16       transformed features of every (src) node
    el:      (Np, 1) f32        a_src . z[src]   (source attention term)
    er:      (T, 1)  f32        a_dst . z[dst]   (destination attention term)
    returns  (T, F)  f32        sum_src softmax_src(leaky_relu(el + er)) * z_src
    """
    f32, bf16 = jnp.float32, jnp.bfloat16
    t, n_src = adj_ref.shape

    # e[dst, src] = leaky_relu(er[dst] + el[src]); the dst/src outer sum is a K=2 NT
    # matmul on the MXU so the (N, 1) columns never need an XLU sublane<->lane move.
    lane_t = lax.broadcasted_iota(jnp.int32, (t, 2), 1)
    lane_s = lax.broadcasted_iota(jnp.int32, (n_src, 2), 1)
    dst_aug = jnp.where(lane_t == 0, er, 1.0).astype(bf16)          # (T, 2)  = [er, 1]
    src_aug = jnp.where(lane_s == 0, 1.0, el).astype(bf16)          # (Np, 2) = [1, el]
    e = lax.dot_general(dst_aug, src_aug, (((1,), (1,)), ((), ())),
                        preferred_element_type=f32)                 # (T, Np)
    e = jnp.where(e > 0.0, e, 0.01 * e)                             # leaky_relu (slope .01)

    # Additive mask recomputed from the int8 adjacency tile (no resident f32 mask).
    e = e + (adj_ref[...].astype(f32) - 1.0) * 1e30

    # Masked softmax over src.  The row max always contributes exp(0) = 1, so the
    # denominator is >= 1 and the reciprocal can never blow up (isolated / padded
    # rows only get a finite uniform fallback that the wrapper slices away).
    m = jnp.max(e, axis=1, keepdims=True)
    p = jnp.exp((e - m).astype(bf16))                               # bf16 exp on the EUP
    denom = jnp.sum(p, axis=1, keepdims=True, dtype=f32)            # f32 accumulation
    inv = pl.reciprocal(denom, approx=True)                         # EUP slot, off VALU path
    alpha = p * inv.astype(bf16)                                    # (T, Np) bf16

    # h[dst] = sum_src alpha[dst, src] * z[src]   (bf16 MXU, f32 accumulate)
    return jnp.dot(alpha, z_src, preferred_element_type=f32)


def _gat_layer1_kernel(h_dst_ref, h_src_ref, adj_ref, w1_ref, a1_ref, out_ref):
    """Layer-1 multi-head GAT + fused ELU for one tile of destination rows."""
    f32, bf16 = jnp.float32, jnp.bfloat16
    num_heads = a1_ref.shape[1] // 2
    hid = w1_ref.shape[1] // num_heads

    # Shared projections (bf16 MXU operands, f32 accumulate); cast to bf16 once.
    z_src = jnp.dot(h_src_ref[...], w1_ref[...], preferred_element_type=f32).astype(bf16)
    z_dst = jnp.dot(h_dst_ref[...], w1_ref[...], preferred_element_type=f32).astype(bf16)
    # Packed attention scores: columns [el_0, er_0, el_1, er_1, ...].
    s_src = jnp.dot(z_src, a1_ref[...], preferred_element_type=f32)   # (Np, 2H)
    s_dst = jnp.dot(z_dst, a1_ref[...], preferred_element_type=f32)   # (T, 2H)

    for h in range(num_heads):                      # tiny H, unrolled at trace time
        el = s_src[:, 2 * h:2 * h + 1]              # source term, every node
        er = s_dst[:, 2 * h + 1:2 * h + 2]          # destination term, this tile
        z_h = z_src[:, h * hid:(h + 1) * hid]
        h_out = _attend(adj_ref, z_h, el, er)       # (T, hid) f32
        # F.elu fused with the store; each head writes its own static column slab
        # (no jnp.concatenate relayout of the head outputs).
        h_out = jnp.where(h_out > 0.0, h_out, jnp.exp(jnp.minimum(h_out, 0.0)) - 1.0)
        out_ref[:, h * hid:(h + 1) * hid] = h_out.astype(out_ref.dtype)


def _gat_layer2_kernel(h1_dst_ref, h1_src_ref, adj_ref, w2_ref, a2_ref, out_ref):
    """Layer-2 single-head GAT for one dst-row tile (output lane-padded to 128)."""
    f32, bf16 = jnp.float32, jnp.bfloat16
    z_src = jnp.dot(h1_src_ref[...], w2_ref[...], preferred_element_type=f32).astype(bf16)
    z_dst = jnp.dot(h1_dst_ref[...], w2_ref[...], preferred_element_type=f32).astype(bf16)
    s_src = jnp.dot(z_src, a2_ref[...], preferred_element_type=f32)   # (Np, 2) = [el, er]
    s_dst = jnp.dot(z_dst, a2_ref[...], preferred_element_type=f32)   # (T, 2)
    out = _attend(adj_ref, z_src, s_src[:, 0:1], s_dst[:, 1:2])       # (T, OUT_PAD) f32
    out_ref[...] = out.astype(out_ref.dtype)                          # lane-dense store


# ------------------------- parameter construction -------------------------

def _xavier_normal(key, out_features, in_features, gain):
    """torch.nn.init.xavier_normal_ on a (out, in) Linear weight."""
    std = gain * (2.0 / (in_features + out_features)) ** 0.5
    return std * jax.random.normal(key, (out_features, in_features), dtype=jnp.float32)


def make_gat_layer_params(key, in_dim, out_dim):
    """One GATLayer: fc (out_dim, in_dim) and attn_fc (1, 2*out_dim), both bias-free."""
    gain = 2.0 ** 0.5  # calculate_gain('relu')
    k_fc, k_attn = jax.random.split(key)
    w_fc = _xavier_normal(k_fc, out_dim, in_dim, gain)           # (out, in)
    w_attn = _xavier_normal(k_attn, 1, 2 * out_dim, gain)        # (1, 2*out)
    w = w_fc.T                                                   # (in, out) for h @ w
    a = w_attn.T                                                 # (2*out, 1)
    return (w, a[:out_dim, :], a[out_dim:, :])                   # (w, a_src, a_dst)


def make_gat_params(key, in_dim, hidden_dim, out_dim, num_heads):
    keys = jax.random.split(key, num_heads + 1)
    layer1 = [make_gat_layer_params(keys[i], in_dim, hidden_dim) for i in range(num_heads)]
    layer2 = [make_gat_layer_params(keys[num_heads], hidden_dim * num_heads, out_dim)]
    return {"layer1": layer1, "layer2": layer2}


def pack_gat_params(params, hidden_dim, out_dim, num_heads):
    """Pack per-head layer-1 params batched along lanes; lane-pad layer-2 to 128."""
    bf16 = jnp.bfloat16
    w1 = jnp.concatenate([w for (w, _, _) in params["layer1"]], axis=1)       # (in, H*hid)
    a1 = jnp.zeros((num_heads * hidden_dim, 2 * num_heads), jnp.float32)
    for i, (_, a_s, a_d) in enumerate(params["layer1"]):
        a1 = a1.at[i * hidden_dim:(i + 1) * hidden_dim, 2 * i].set(a_s[:, 0])
        a1 = a1.at[i * hidden_dim:(i + 1) * hidden_dim, 2 * i + 1].set(a_d[:, 0])
    w2, a2_s, a2_d = params["layer2"][0]
    out_pad = _round_up(out_dim, _LANE)                # lane-dense final output columns
    w2_p = jnp.zeros((w2.shape[0], out_pad), jnp.float32).at[:, :out_dim].set(w2)
    a2_p = jnp.zeros((out_pad, 2), jnp.float32)
    a2_p = a2_p.at[:out_dim, 0].set(a2_s[:, 0]).at[:out_dim, 1].set(a2_d[:, 0])
    # All matmul operands bf16 (single-pass MXU, half the DMA); attention logits are
    # effectively bf16 everywhere, consistently (accepted ~1e-3 rel. error vs f32).
    return {"w1": w1.astype(bf16), "a1": a1.astype(bf16),
            "w2": w2_p.astype(bf16), "a2": a2_p.astype(bf16), "out_dim": out_dim}


# ------------------------------ forward pass ------------------------------

def _pick_dst_tile(n_pad, budget_bytes=24 * 1024 * 1024, bytes_per_elem=20):
    """Largest dst-row tile (multiple of 128) whose ~O(TILE*N) live set fits the budget."""
    tile = min(512, n_pad)
    while tile > _LANE and (n_pad % tile != 0 or tile * n_pad * bytes_per_elem > budget_bytes):
        tile -= _LANE
    return max(tile, _LANE)
    # TODO(synk): for N where even a 128-row x N-src tile overflows VMEM, add src
    # tiling with a flash-style online softmax (m/l/acc scratch, src axis "arbitrary").


def _vmem_limit_bytes():
    try:
        cap = pltpu.get_tpu_info().vmem_capacity_bytes   # 128 MiB v5e/v6e, 64 MiB v7x
    except Exception:
        cap = 64 * 1024 * 1024
    return int(min(100 * 1024 * 1024, (cap * 3) // 4))   # ~96 MiB v5e/v6e, ~48 MiB v7x


def _cost(n_pad, tile, d_in, d_mid, heads, agg_cols, io_in_bytes, io_out_bytes):
    steps = n_pad // tile
    flops = int(2 * (steps + 1) * n_pad * d_in * d_mid
                + heads * n_pad * n_pad * (2 * agg_cols + 12))
    return pl.CostEstimate(flops=flops,
                           transcendentals=int(heads * n_pad * n_pad),
                           bytes_accessed=int(n_pad * n_pad + io_in_bytes + io_out_bytes))


def gat_forward(h, adj, packed):
    """Full GAT forward: layer-1 multi-head + ELU, then layer-2; dst-row tiled grid."""
    bf16 = jnp.bfloat16
    n, in_dim = h.shape
    hh = packed["w1"].shape[1]                 # hidden_dim * num_heads
    num_heads = packed["a1"].shape[1] // 2
    out_pad = packed["w2"].shape[1]
    out_dim = packed["out_dim"]

    n_pad = _round_up(max(n, _LANE), _LANE)
    tile = _pick_dst_tile(n_pad)
    grid = (n_pad // tile,)

    # Zero-pad nodes to a lane multiple; padded rows have no edges and are sliced off.
    h_p = jnp.zeros((n_pad, in_dim), bf16).at[:n, :].set(h.astype(bf16))
    adj_p = jnp.zeros((n_pad, n_pad), jnp.int8).at[:n, :n].set(adj.astype(jnp.int8))

    cparams = pltpu.CompilerParams(
        dimension_semantics=("parallel",),               # shard dst tiles across cores (v7x)
        vmem_limit_bytes=_vmem_limit_bytes())

    def full_spec(arr):
        shape = arr.shape
        return pl.BlockSpec(shape, lambda i: (0,) * len(shape))   # resident across steps

    def row_spec(cols):
        return pl.BlockSpec((tile, cols), lambda i: (i, 0))

    # TODO(synk): if the adjacency DMA shows up exposed in a profile, switch its spec
    # to pipeline_mode=pl.Buffered(3) and shrink `tile` accordingly on v7x.

    # ---- layer 1 (all heads, ELU fused) -> h1 (bf16, exactly the layer-2 MXU dtype)
    h1 = pl.pallas_call(
        _gat_layer1_kernel,
        out_shape=jax.ShapeDtypeStruct((n_pad, hh), bf16),
        grid=grid,
        in_specs=[row_spec(in_dim),          # h rows for this dst tile
                  full_spec(h_p),            # h for every src node (resident)
                  row_spec(n_pad),           # int8 adjacency tile (only O(N^2) stream)
                  full_spec(packed["w1"]),
                  full_spec(packed["a1"])],
        out_specs=row_spec(hh),
        compiler_params=cparams,
        cost_estimate=_cost(n_pad, tile, in_dim, hh, num_heads, hh // num_heads,
                            4 * n_pad * in_dim, 2 * n_pad * hh),
    )(h_p, h_p, adj_p, packed["w1"], packed["a1"])

    # ---- layer 2 (single head), output lane-padded to a multiple of 128
    out_p = pl.pallas_call(
        _gat_layer2_kernel,
        out_shape=jax.ShapeDtypeStruct((n_pad, out_pad), jnp.float32),
        grid=grid,
        in_specs=[row_spec(hh),
                  full_spec(h1),
                  row_spec(n_pad),
                  full_spec(packed["w2"]),
                  full_spec(packed["a2"])],
        out_specs=row_spec(out_pad),
        compiler_params=cparams,
        cost_estimate=_cost(n_pad, tile, hh, out_pad, 1, out_pad,
                            4 * n_pad * hh, 4 * n_pad * out_pad),
    )(h1, h1, adj_p, packed["w2"], packed["a2"])

    return out_p[:n, :out_dim]


# --------------------------------- driver ---------------------------------

if __name__ == "__main__":
    N = 16          # number of graph nodes
    IN_DIM = 8
    HIDDEN_DIM = 8
    OUT_DIM = 4
    NUM_HEADS = 2

    key = jax.random.PRNGKey(0)
    k_h, k_params = jax.random.split(key)

    # deterministic node features
    h = jax.random.normal(k_h, (N, IN_DIM), dtype=jnp.float32)

    # deterministic synthetic graph: ring (i -> i+1) plus self-loops, adj[dst, src]
    adj = jnp.zeros((N, N), dtype=jnp.float32)
    src = jnp.arange(N)
    dst = (src + 1) % N
    adj = adj.at[dst, src].set(1.0)            # ring edges src -> dst
    adj = adj.at[src, src].set(1.0)            # self-loops

    # Dense masked softmax == DGL per-node edge softmax only if every node has >= 1
    # in-edge; the self-loops above guarantee it.  Assert it explicitly.
    assert bool(jnp.all(adj.sum(axis=1) >= 1.0)), "every node needs >= 1 in-edge"

    params = make_gat_params(k_params, IN_DIM, HIDDEN_DIM, OUT_DIM, NUM_HEADS)
    packed = pack_gat_params(params, HIDDEN_DIM, OUT_DIM, NUM_HEADS)

    out = gat_forward(h, adj, packed)
    out = jax.block_until_ready(out)
    assert out.shape == (N, OUT_DIM), out.shape
    assert bool(jnp.all(jnp.isfinite(out)))
    print("KERNEL_OK")
</pallas_src>

<mosaic_0001>
module attributes {stable_mosaic.version = 11 : i64} {
  func.func @_gat_layer1_kernel(%arg0: i32, %arg1: memref<128x8xbf16, #tpu.memory_space<vmem>>, %arg2: memref<128x8xbf16, #tpu.memory_space<vmem>>, %arg3: memref<128x128xi8, #tpu.memory_space<vmem>>, %arg4: memref<8x16xbf16, #tpu.memory_space<vmem>>, %arg5: memref<16x4xbf16, #tpu.memory_space<vmem>>, %arg6: memref<128x16xbf16, #tpu.memory_space<vmem>>) attributes {dimension_semantics = [#tpu.dimension_semantics<parallel>], iteration_bounds = array<i64: 1>, scalar_prefetch = 0 : i64, scratch_operands = 0 : i64, tpu.core_type = #tpu.core_type<tc>, window_params = [{transform_indices = @transform_0, window_bounds = array<i64: 128, 8>}, {pipeline_mode = #tpu.pipeline_mode<synchronous>, transform_indices = @transform_1, window_bounds = array<i64: 128, 8>}, {transform_indices = @transform_2, window_bounds = array<i64: 128, 128>}, {pipeline_mode = #tpu.pipeline_mode<synchronous>, transform_indices = @transform_3, window_bounds = array<i64: 8, 16>}, {pipeline_mode = #tpu.pipeline_mode<synchronous>, transform_indices = @transform_4, window_bounds = array<i64: 16, 4>}, {transform_indices = @transform_5, window_bounds = array<i64: 128, 16>}]} {
    %c0 = arith.constant 0 : index
    %c0_0 = arith.constant 0 : index
    %0 = vector.load %arg2[%c0, %c0_0] : memref<128x8xbf16, #tpu.memory_space<vmem>>, vector<128x8xbf16>
    %c0_1 = arith.constant 0 : index
    %c0_2 = arith.constant 0 : index
    %1 = vector.load %arg4[%c0_1, %c0_2] : memref<8x16xbf16, #tpu.memory_space<vmem>>, vector<8x16xbf16>
    %cst = arith.constant dense<0.000000e+00> : vector<128x16xf32>
    %2 = tpu.matmul %0, %1, %cst {dimension_numbers = #tpu.dot_dimension_numbers<[1], [0], [0], [1], [0, 0, 1, 1], [], []>} : vector<128x8xbf16>, vector<8x16xbf16>, vector<128x16xf32> -> vector<128x16xf32>
    %3 = arith.truncf %2 : vector<128x16xf32> to vector<128x16xbf16>
    %c0_3 = arith.constant 0 : index
    %c0_4 = arith.constant 0 : index
    %4 = vector.load %arg1[%c0_3, %c0_4] : memref<128x8xbf16, #tpu.memory_space<vmem>>, vector<128x8xbf16>
    %c0_5 = arith.constant 0 : index
    %c0_6 = arith.constant 0 : index
    %5 = vector.load %arg4[%c0_5, %c0_6] : memref<8x16xbf16, #tpu.memory_space<vmem>>, vector<8x16xbf16>
    %cst_7 = arith.constant dense<0.000000e+00> : vector<128x16xf32>
    %6 = tpu.matmul %4, %5, %cst_7 {dimension_numbers = #tpu.dot_dimension_numbers<[1], [0], [0], [1], [0, 0, 1, 1], [], []>} : vector<128x8xbf16>, vector<8x16xbf16>, vector<128x16xf32> -> vector<128x16xf32>
    %7 = arith.truncf %6 : vector<128x16xf32> to vector<128x16xbf16>
    %c0_8 = arith.constant 0 : index
    %c0_9 = arith.constant 0 : index
    %8 = vector.load %arg5[%c0_8, %c0_9] : memref<16x4xbf16, #tpu.memory_space<vmem>>, vector<16x4xbf16>
    %cst_10 = arith.constant dense<0.000000e+00> : vector<128x4xf32>
    %9 = tpu.matmul %3, %8, %cst_10 {dimension_numbers = #tpu.dot_dimension_numbers<[1], [0], [0], [1], [0, 0, 1, 1], [], []>} : vector<128x16xbf16>, vector<16x4xbf16>, vector<128x4xf32> -> vector<128x4xf32>
    %c0_11 = arith.constant 0 : index
    %c0_12 = arith.constant 0 : index
    %10 = vector.load %arg5[%c0_11, %c0_12] : memref<16x4xbf16, #tpu.memory_space<vmem>>, vector<16x4xbf16>
    %cst_13 = arith.constant dense<0.000000e+00> : vector<128x4xf32>
    %11 = tpu.matmul %7, %10, %cst_13 {dimension_numbers = #tpu.dot_dimension_numbers<[1], [0], [0], [1], [0, 0, 1, 1], [], []>} : vector<128x16xbf16>, vector<16x4xbf16>, vector<128x4xf32> -> vector<128x4xf32>
    %12 = vector.extract_strided_slice %9 {offsets = [0, 0], sizes = [128, 1], strides = [1, 1]} : vector<128x4xf32> to vector<128x1xf32>
    %13 = vector.extract_strided_slice %11 {offsets = [0, 1], sizes = [128, 1], strides = [1, 1]} : vector<128x4xf32> to vector<128x1xf32>
    %14 = vector.extract_strided_slice %3 {offsets = [0, 0], sizes = [128, 8], strides = [1, 1]} : vector<128x16xbf16> to vector<128x8xbf16>
    %15 = tpu.iota {dimensions = array<i32: 1>} : vector<128x2xi32>
    %16 = tpu.iota {dimensions = array<i32: 1>} : vector<128x2xi32>
    %c0_i32 = arith.constant 0 : i32
    %17 = vector.broadcast %c0_i32 : i32 to vector<128x2xi32>
    %18 = arith.cmpi eq, %15, %17 : vector<128x2xi32>
    %cst_14 = arith.constant 1.000000e+00 : f32
    %19 = vector.shape_cast %13 : vector<128x1xf32> to vector<128x1xf32>
    %20 = vector.broadcast %19 : vector<128x1xf32> to vector<128x2xf32>
    %21 = vector.broadcast %cst_14 : f32 to vector<128x2xf32>
    %22 = arith.select %18, %20, %21 : vector<128x2xi1>, vector<128x2xf32>
    %23 = arith.truncf %22 : vector<128x2xf32> to vector<128x2xbf16>
    %c0_i32_15 = arith.constant 0 : i32
    %24 = vector.broadcast %c0_i32_15 : i32 to vector<128x2xi32>
    %25 = arith.cmpi eq, %16, %24 : vector<128x2xi32>
    %cst_16 = arith.constant 1.000000e+00 : f32
    %26 = vector.broadcast %cst_16 : f32 to vector<128x2xf32>
    %27 = vector.shape_cast %12 : vector<128x1xf32> to vector<128x1xf32>
    %28 = vector.broadcast %27 : vector<128x1xf32> to vector<128x2xf32>
    %29 = arith.select %25, %26, %28 : vector<128x2xi1>, vector<128x2xf32>
    %30 = arith.truncf %29 : vector<128x2xf32> to vector<128x2xbf16>
    %cst_17 = arith.constant dense<0.000000e+00> : vector<128x128xf32>
    %31 = tpu.matmul %23, %30, %cst_17 {dimension_numbers = #tpu.dot_dimension_numbers<[1], [1], [0], [0], [0, 0, 1, 0], [], []>} : vector<128x2xbf16>, vector<128x2xbf16>, vector<128x128xf32> -> vector<128x128xf32>
    %cst_18 = arith.constant 0.000000e+00 : f32
    %32 = vector.broadcast %cst_18 : f32 to vector<128x128xf32>
    %33 = arith.cmpf ogt, %31, %32 : vector<128x128xf32>
    %cst_19 = arith.constant 0.00999999977 : f32
    %34 = vector.broadcast %cst_19 : f32 to vector<128x128xf32>
    %35 = arith.mulf %34, %31 : vector<128x128xf32>
    %36 = arith.select %33, %31, %35 : vector<128x128xi1>, vector<128x128xf32>
    %c0_20 = arith.constant 0 : index
    %c0_21 = arith.constant 0 : index
    %37 = vector.load %arg3[%c0_20, %c0_21] : memref<128x128xi8, #tpu.memory_space<vmem>>, vector<128x128xi8>
    %38 = arith.sitofp %37 : vector<128x128xi8> to vector<128x128xf32>
    %cst_22 = arith.constant 1.000000e+00 : f32
    %39 = vector.broadcast %cst_22 : f32 to vector<128x128xf32>
    %40 = arith.subf %38, %39 : vector<128x128xf32>
    %cst_23 = arith.constant 1.000000e+30 : f32
    %41 = vector.broadcast %cst_23 : f32 to vector<128x128xf32>
    %42 = arith.mulf %40, %41 : vector<128x128xf32>
    %43 = arith.addf %36, %42 : vector<128x128xf32>
    %cst_24 = arith.constant dense<0xFF800000> : vector<128xf32>
    %44 = vector.multi_reduction <maximumf>, %43, %cst_24 [1] : vector<128x128xf32> to vector<128xf32>
    %45 = vector.shape_cast %44 : vector<128xf32> to vector<128x1xf32>
    %46 = vector.broadcast %45 : vector<128x1xf32> to vector<128x128xf32>
    %47 = arith.subf %43, %46 : vector<128x128xf32>
    %48 = arith.truncf %47 : vector<128x128xf32> to vector<128x128xbf16>
    %49 = math.exp %48 : vector<128x128xbf16>
    %50 = arith.extf %49 : vector<128x128xbf16> to vector<128x128xf32>
    %cst_25 = arith.constant dense<0.000000e+00> : vector<128xf32>
    %51 = vector.multi_reduction <add>, %50, %cst_25 [1] : vector<128x128xf32> to vector<128xf32>
    %52 = vector.shape_cast %51 : vector<128xf32> to vector<128x1xf32>
    %53 = tpu.reciprocal %52 {approx = true} : vector<128x1xf32> -> vector<128x1xf32>
    %54 = arith.truncf %53 : vector<128x1xf32> to vector<128x1xbf16>
    %55 = vector.broadcast %54 : vector<128x1xbf16> to vector<128x128xbf16>
    %56 = arith.mulf %49, %55 : vector<128x128xbf16>
    %cst_26 = arith.constant dense<0.000000e+00> : vector<128x8xf32>
    %57 = tpu.matmul %56, %14, %cst_26 {dimension_numbers = #tpu.dot_dimension_numbers<[1], [0], [0], [1], [0, 0, 1, 1], [], []>} : vector<128x128xbf16>, vector<128x8xbf16>, vector<128x8xf32> -> vector<128x8xf32>
    %cst_27 = arith.constant 0.000000e+00 : f32
    %58 = vector.broadcast %cst_27 : f32 to vector<128x8xf32>
    %59 = arith.cmpf ogt, %57, %58 : vector<128x8xf32>
    %cst_28 = arith.constant 0.000000e+00 : f32
    %60 = vector.broadcast %cst_28 : f32 to vector<128x8xf32>
    %61 = arith.minimumf %57, %60 : vector<128x8xf32>
    %62 = math.exp %61 : vector<128x8xf32>
    %cst_29 = arith.constant 1.000000e+00 : f32
    %63 = vector.broadcast %cst_29 : f32 to vector<128x8xf32>
    %64 = arith.subf %62, %63 : vector<128x8xf32>
    %65 = arith.select %59, %57, %64 : vector<128x8xi1>, vector<128x8xf32>
    %66 = arith.truncf %65 : vector<128x8xf32> to vector<128x8xbf16>
    %c0_30 = arith.constant 0 : index
    %c0_31 = arith.constant 0 : index
    %67 = vector.load %arg6[%c0_30, %c0_31] : memref<128x16xbf16, #tpu.memory_space<vmem>>, vector<128x8xbf16>
    tpu.vector_store %arg6[%c0_30, %c0_31], %66 {strides = array<i32>} : memref<128x16xbf16, #tpu.memory_space<vmem>>, vector<128x8xbf16>,
    %68 = vector.extract_strided_slice %9 {offsets = [0, 2], sizes = [128, 1], strides = [1, 1]} : vector<128x4xf32> to vector<128x1xf32>
    %69 = vector.extract_strided_slice %11 {offsets = [0, 3], sizes = [128, 1], strides = [1, 1]} : vector<128x4xf32> to vector<128x1xf32>
    %70 = vector.extract_strided_slice %3 {offsets = [0, 8], sizes = [128, 8], strides = [1, 1]} : vector<128x16xbf16> to vector<128x8xbf16>
    %71 = tpu.iota {dimensions = array<i32: 1>} : vector<128x2xi32>
    %72 = tpu.iota {dimensions = array<i32: 1>} : vector<128x2xi32>
    %c0_i32_32 = arith.constant 0 : i32
    %73 = vector.broadcast %c0_i32_32 : i32 to vector<128x2xi32>
    %74 = arith.cmpi eq, %71, %73 : vector<128x2xi32>
    %cst_33 = arith.constant 1.000000e+00 : f32
    %75 = vector.shape_cast %69 : vector<128x1xf32> to vector<128x1xf32>
    %76 = vector.broadcast %75 : vector<128x1xf32> to vector<128x2xf32>
    %77 = vector.broadcast %cst_33 : f32 to vector<128x2xf32>
    %78 = arith.select %74, %76, %77 : vector<128x2xi1>, vector<128x2xf32>
    %79 = arith.truncf %78 : vector<128x2xf32> to vector<128x2xbf16>
    %c0_i32_34 = arith.constant 0 : i32
    %80 = vector.broadcast %c0_i32_34 : i32 to vector<128x2xi32>
    %81 = arith.cmpi eq, %72, %80 : vector<128x2xi32>
    %cst_35 = arith.constant 1.000000e+00 : f32
    %82 = vector.broadcast %cst_35 : f32 to vector<128x2xf32>
    %83 = vector.shape_cast %68 : vector<128x1xf32> to vector<128x1xf32>
    %84 = vector.broadcast %83 : vector<128x1xf32> to vector<128x2xf32>
    %85 = arith.select %81, %82, %84 : vector<128x2xi1>, vector<128x2xf32>
    %86 = arith.truncf %85 : vector<128x2xf32> to vector<128x2xbf16>
    %cst_36 = arith.constant dense<0.000000e+00> : vector<128x128xf32>
    %87 = tpu.matmul %79, %86, %cst_36 {dimension_numbers = #tpu.dot_dimension_numbers<[1], [1], [0], [0], [0, 0, 1, 0], [], []>} : vector<128x2xbf16>, vector<128x2xbf16>, vector<128x128xf32> -> vector<128x128xf32>
    %cst_37 = arith.constant 0.000000e+00 : f32
    %88 = vector.broadcast %cst_37 : f32 to vector<128x128xf32>
    %89 = arith.cmpf ogt, %87, %88 : vector<128x128xf32>
    %cst_38 = arith.constant 0.00999999977 : f32
    %90 = vector.broadcast %cst_38 : f32 to vector<128x128xf32>
    %91 = arith.mulf %90, %87 : vector<128x128xf32>
    %92 = arith.select %89, %87, %91 : vector<128x128xi1>, vector<128x128xf32>
    %c0_39 = arith.constant 0 : index
    %c0_40 = arith.constant 0 : index
    %93 = vector.load %arg3[%c0_39, %c0_40] : memref<128x128xi8, #tpu.memory_space<vmem>>, vector<128x128xi8>
    %94 = arith.sitofp %93 : vector<128x128xi8> to vector<128x128xf32>
    %cst_41 = arith.constant 1.000000e+00 : f32
    %95 = vector.broadcast %cst_41 : f32 to vector<128x128xf32>
    %96 = arith.subf %94, %95 : vector<128x128xf32>
    %cst_42 = arith.constant 1.000000e+30 : f32
    %97 = vector.broadcast %cst_42 : f32 to vector<128x128xf32>
    %98 = arith.mulf %96, %97 : vector<128x128xf32>
    %99 = arith.addf %92, %98 : vector<128x128xf32>
    %cst_43 = arith.constant dense<0xFF800000> : vector<128xf32>
    %100 = vector.multi_reduction <maximumf>, %99, %cst_43 [1] : vector<128x128xf32> to vector<128xf32>
    %101 = vector.shape_cast %100 : vector<128xf32> to vector<128x1xf32>
    %102 = vector.broadcast %101 : vector<128x1xf32> to vector<128x128xf32>
    %103 = arith.subf %99, %102 : vector<128x128xf32>
    %104 = arith.truncf %103 : vector<128x128xf32> to vector<128x128xbf16>
    %105 = math.exp %104 : vector<128x128xbf16>
    %106 = arith.extf %105 : vector<128x128xbf16> to vector<128x128xf32>
    %cst_44 = arith.constant dense<0.000000e+00> : vector<128xf32>
    %107 = vector.multi_reduction <add>, %106, %cst_44 [1] : vector<128x128xf32> to vector<128xf32>
    %108 = vector.shape_cast %107 : vector<128xf32> to vector<128x1xf32>
    %109 = tpu.reciprocal %108 {approx = true} : vector<128x1xf32> -> vector<128x1xf32>
    %110 = arith.truncf %109 : vector<128x1xf32> to vector<128x1xbf16>
    %111 = vector.broadcast %110 : vector<128x1xbf16> to vector<128x128xbf16>
    %112 = arith.mulf %105, %111 : vector<128x128xbf16>
    %cst_45 = arith.constant dense<0.000000e+00> : vector<128x8xf32>
    %113 = tpu.matmul %112, %70, %cst_45 {dimension_numbers = #tpu.dot_dimension_numbers<[1], [0], [0], [1], [0, 0, 1, 1], [], []>} : vector<128x128xbf16>, vector<128x8xbf16>, vector<128x8xf32> -> vector<128x8xf32>
    %cst_46 = arith.constant 0.000000e+00 : f32
    %114 = vector.broadcast %cst_46 : f32 to vector<128x8xf32>
    %115 = arith.cmpf ogt, %113, %114 : vector<128x8xf32>
    %cst_47 = arith.constant 0.000000e+00 : f32
    %116 = vector.broadcast %cst_47 : f32 to vector<128x8xf32>
    %117 = arith.minimumf %113, %116 : vector<128x8xf32>
    %118 = math.exp %117 : vector<128x8xf32>
    %cst_48 = arith.constant 1.000000e+00 : f32
    %119 = vector.broadcast %cst_48 : f32 to vector<128x8xf32>
    %120 = arith.subf %118, %119 : vector<128x8xf32>
    %121 = arith.select %115, %113, %120 : vector<128x8xi1>, vector<128x8xf32>
    %122 = arith.truncf %121 : vector<128x8xf32> to vector<128x8xbf16>
    %c0_49 = arith.constant 0 : index
    %c8 = arith.constant 8 : index
    %123 = vector.load %arg6[%c0_49, %c8] : memref<128x16xbf16, #tpu.memory_space<vmem>>, vector<128x8xbf16>
    tpu.vector_store %arg6[%c0_49, %c8], %122 {strides = array<i32>} : memref<128x16xbf16, #tpu.memory_space<vmem>>, vector<128x8xbf16>,
    return
  }
  func.func @transform_0(%arg0: i32) -> (i32, i32) {
    %c0_i32 = arith.constant 0 : i32
    %c0_i32_0 = arith.constant 0 : i32
    return %arg0, %c0_i32 : i32, i32
  }
  func.func @transform_1(%arg0: i32) -> (i32, i32) {
    %c0_i32 = arith.constant 0 : i32
    %c0_i32_0 = arith.constant 0 : i32
    %c0_i32_1 = arith.constant 0 : i32
    return %c0_i32, %c0_i32_0 : i32, i32
  }
  func.func @transform_2(%arg0: i32) -> (i32, i32) {
    %c0_i32 = arith.constant 0 : i32
    %c0_i32_0 = arith.constant 0 : i32
    return %arg0, %c0_i32 : i32, i32
  }
  func.func @transform_3(%arg0: i32) -> (i32, i32) {
    %c0_i32 = arith.constant 0 : i32
    %c0_i32_0 = arith.constant 0 : i32
    %c0_i32_1 = arith.constant 0 : i32
    return %c0_i32, %c0_i32_0 : i32, i32
  }
  func.func @transform_4(%arg0: i32) -> (i32, i32) {
    %c0_i32 = arith.constant 0 : i32
    %c0_i32_0 = arith.constant 0 : i32
    %c0_i32_1 = arith.constant 0 : i32
    return %c0_i32, %c0_i32_0 : i32, i32
  }
  func.func @transform_5(%arg0: i32) -> (i32, i32) {
    %c0_i32 = arith.constant 0 : i32
    %c0_i32_0 = arith.constant 0 : i32
    return %arg0, %c0_i32 : i32, i32
  }
}

</mosaic_0001>

<bundles_post_ra>
// kernel: tpu_custom_call.1
= control target key start
LH: loop header
LB: loop body
LE: loop exit
PB: predicated region body
PF: predicated region fallthrough
CT: control target
= control target key end

     0   :  { %vm103_vm0 = vcmask 1043456   ;;  %vm78_vm1 = vcmask 64512   ;;  %vm357_vm2 = vcmask 130048   ;;  %vm715_vm4 = vcmask 15360   ;;  %s3809_s3 = inlined_call_operand.vmem [shape: bf16[8,16], index: 3, kind: input, shape index: {}]   ;;  %s3810_s1 = inlined_call_operand.vmem [shape: bf16[128,8], index: 1, kind: input, shape index: {}]   ;;  %s3811_s0 = inlined_call_operand.vmem [shape: bf16[128,8], index: 0, kind: input, shape index: {}]   ;;  %s3812_s4 = inlined_call_operand.vmem [shape: bf16[16,4], index: 4, kind: input, shape index: {}]   ;;  %s3813_s2 = inlined_call_operand.vmem [shape: s8[128,128], index: 2, kind: input, shape index: {}]   ;;  %s3814_s5 = inlined_call_operand.vmem [shape: bf16[128,16], index: 5, kind: output, shape index: {}]  }
   0x1   :  { %v37_v0 = vld [vmem:[%s3809_s3] sm:$0xf]  ;;  %v2483_v3 = vld [vmem:[%s3810_s1 + $0x8] sm:$0xff]  ;;  %v2484_v5 = vld [vmem:[%s3810_s1 + $0x10] sm:$0xff] }
   0x2   :  { %v105_v1 = vsel %vm103_vm0, %v37_v0, 0  ;;  %v2482_v2 = vld [vmem:[%s3810_s1] sm:$0xff]  ;;  %v2491_v6 = vld [vmem:[%s3811_s0 + $0x8] sm:$0xff]  ;;  %v2485_v7 = vld [vmem:[%s3810_s1 + $0x18] sm:$0xff] }
   0x3   :  { %114 = vmatpush.bf16.msra.mxu0 %v105_v1  ;;  %259 = vmatpush.bf16.msra.mxu1 %v105_v1  ;;  %v2490_v4 = vld [vmem:[%s3811_s0] sm:$0xff]  ;;  %v2492_v8 = vld [vmem:[%s3811_s0 + $0x10] sm:$0xff]  ;;  %v2493_v10 = vld [vmem:[%s3811_s0 + $0x18] sm:$0xff] }
   0x4   :  { %v2486_v9 = vld [vmem:[%s3810_s1 + $0x20] sm:$0xff]  ;;  %v2487_v11 = vld [vmem:[%s3810_s1 + $0x28] sm:$0xff]  ;;  %v2488_v13 = vld [vmem:[%s3810_s1 + $0x30] sm:$0xff] }
   0x5   :  { %v2494_v12 = vld [vmem:[%s3811_s0 + $0x20] sm:$0xff]  ;;  %v2495_v14 = vld [vmem:[%s3811_s0 + $0x28] sm:$0xff]  ;;  %v2489_v16 = vld [vmem:[%s3810_s1 + $0x38] sm:$0xff] }
   0x6   :  { %2334 = vmatmul.msk.bf16.vlgmr.msra.gmra.mxu0 %vm78_vm1, %v2482_v2  ;;  %2374 = vmatmul.msk.bf16.vlgmr.msra.gmra.mxu1 %vm78_vm1, %v2490_v4  ;;  %v2498_v15 = vld [vmem:[%s3812_s4] sm:$0xff]  ;;  %v2496_v17 = vld [vmem:[%s3811_s0 + $0x30] sm:$0xff]  ;;  %v2497_v20 = vld [vmem:[%s3811_s0 + $0x38] sm:$0xff]  ;;  %s2874_s0 = smov 120  }
   0x7   :  { %389 = vmatpush.bf16.msra.mxu2 %v2498_v15  ;;  %462 = vmatpush.bf16.msra.mxu3 %v2498_v15 }
  0x16   :  { %2335 = vmatmul.msk.bf16.gmra.mxu0 %vm78_vm1, %v2483_v3  ;;  %2375 = vmatmul.msk.bf16.gmra.mxu1 %vm78_vm1, %v2491_v6 }
  0x26   :  { %2336 = vmatmul.msk.bf16.gmra.mxu0 %vm78_vm1, %v2484_v5  ;;  %2376 = vmatmul.msk.bf16.gmra.mxu1 %vm78_vm1, %v2492_v8 }
  0x36   :  { %2337 = vmatmul.msk.bf16.gmra.mxu0 %vm78_vm1, %v2485_v7  ;;  %2377 = vmatmul.msk.bf16.gmra.mxu1 %vm78_vm1, %v2493_v10 }
  0x46   :  { %2338 = vmatmul.msk.bf16.gmra.mxu0 %vm78_vm1, %v2486_v9  ;;  %2378 = vmatmul.msk.bf16.gmra.mxu1 %vm78_vm1, %v2494_v12 }
  0x56   :  { %2339 = vmatmul.msk.bf16.gmra.mxu0 %vm78_vm1, %v2487_v11  ;;  %2379 = vmatmul.msk.bf16.gmra.mxu1 %vm78_vm1, %v2495_v14 }
  0x66   :  { %2340 = vmatmul.msk.bf16.gmra.mxu0 %vm78_vm1, %v2488_v13  ;;  %2380 = vmatmul.msk.bf16.gmra.mxu1 %vm78_vm1, %v2496_v17 }
  0x76   :  { %2341 = vmatmul.msk.bf16.gmra.mxu0 %vm78_vm1, %v2489_v16  ;;  %2381 = vmatmul.msk.bf16.gmra.mxu1 %vm78_vm1, %v2497_v20 }
  0x83   :  { %v116_v18 = vpop.f32.mrf.mxu0  ;;  %v261_v27 = vpop.f32.mrf.mxu1 }
  0x84   :  { %v156_v19 = vpack.c.bf16 %v116_v18, %v116_v18 }
  0x86   :  { %v327_v23 = vunpack.c.l.b16 %v156_v19 }
  0x8b   :  { %v118_v21 = vpop.f32.mrf.mxu0  ;;  %v263_v33 = vpop.f32.mrf.mxu1 }
  0x8c   :  { %v157_v22 = vpack.c.bf16 %v118_v21, %v118_v21  ;;  %v301_v34 = vpack.c.bf16 %v263_v33, %v261_v27 }
  0x8e   :  { %v328_v24 = vunpack.c.l.b16 %v157_v22  ;;  %2394 = vmatmul.msk.bf16.vlgmr.msra.gmra.mxu3 %vm357_vm2, %v301_v34 }
  0x90   :  { %v2976_v25 = vpack.c.b16 %v328_v24, %v327_v23 }
  0x92   :  { %2386 = vmatmul.msk.bf16.vlgmr.msra.gmra.mxu2 %vm357_vm2, %v2976_v25 }
  0x93   :  { %v121_v26 = vpop.f32.mrf.mxu0  ;;  %v266_v37 = vpop.f32.mrf.mxu1 }
  0x94   :  { %v158_v28 = vpack.c.bf16 %v121_v26, %v121_v26 }
  0x96   :  { %v329_v31 = vunpack.c.l.b16 %v158_v28 }
  0x9b   :  { %v123_v29 = vpop.f32.mrf.mxu0  ;;  %v268_v44 = vpop.f32.mrf.mxu1 }
  0x9c   :  { %v159_v30 = vpack.c.bf16 %v123_v29, %v123_v29  ;;  %v302_v45 = vpack.c.bf16 %v268_v44, %v266_v37 }
  0x9e   :  { %v330_v32 = vunpack.c.l.b16 %v159_v30  ;;  %2395 = vmatmul.msk.bf16.gmra.mxu3 %vm357_vm2, %v302_v45 }
  0xa0   :  { %v2980_v35 = vpack.c.b16 %v330_v32, %v329_v31 }
  0xa2   :  { %2387 = vmatmul.msk.bf16.gmra.mxu2 %vm357_vm2, %v2980_v35 }
  0xa3   :  { %v126_v36 = vpop.f32.mrf.mxu0  ;;  %v271_v47 = vpop.f32.mrf.mxu1 }
  0xa4   :  { %v160_v38 = vpack.c.bf16 %v126_v36, %v126_v36 }
  0xa6   :  { %v331_v41 = vunpack.c.l.b16 %v160_v38 }
  0xab   :  { %v128_v39 = vpop.f32.mrf.mxu0  ;;  %v273_v54 = vpop.f32.mrf.mxu1 }
  0xac   :  { %v161_v40 = vpack.c.bf16 %v128_v39, %v128_v39  ;;  %v303_v55 = vpack.c.bf16 %v273_v54, %v271_v47 }
  0xae   :  { %v332_v42 = vunpack.c.l.b16 %v161_v40  ;;  %2396 = vmatmul.msk.bf16.gmra.mxu3 %vm357_vm2, %v303_v55 }
  0xb0   :  { %v2985_v43 = vpack.c.b16 %v332_v42, %v331_v41 }
  0xb2   :  { %2388 = vmatmul.msk.bf16.gmra.mxu2 %vm357_vm2, %v2985_v43 }
  0xb3   :  { %v131_v46 = vpop.f32.mrf.mxu0  ;;  %v276_v57 = vpop.f32.mrf.mxu1 }
  0xb4   :  { %v162_v48 = vpack.c.bf16 %v131_v46, %v131_v46 }
  0xb6   :  { %v333_v51 = vunpack.c.l.b16 %v162_v48  ;;  %v2870_v48 = vmov 2  }
  0xb7   :  { %2528 = vset.pattern.permute.xlu2 %v2870_v48  ;;  %2517 = vset.pattern.permute.xlu1 %v2870_v48 }
  0xbb   :  { %v133_v49 = vpop.f32.mrf.mxu0  ;;  %v278_v0 = vpop.f32.mrf.mxu1 }
  0xbc   :  { %v163_v50 = vpack.c.bf16 %v133_v49, %v133_v49  ;;  %v304_v1 = vpack.c.bf16 %v278_v0, %v276_v57 }
  0xbe   :  { %v334_v52 = vunpack.c.l.b16 %v163_v50  ;;  %2397 = vmatmul.msk.bf16.gmra.mxu3 %vm357_vm2, %v304_v1 }
  0xc0   :  { %v2990_v53 = vpack.c.b16 %v334_v52, %v333_v51 }
  0xc2   :  { %2389 = vmatmul.msk.bf16.gmra.mxu2 %vm357_vm2, %v2990_v53 }
  0xc3   :  { %v136_v56 = vpop.f32.mrf.mxu0  ;;  %v281_v3 = vpop.f32.mrf.mxu1 }
  0xc4   :  { %v164_v58 = vpack.c.bf16 %v136_v56, %v136_v56  ;;  %v2871_v56 = vmov 1  }
  0xc5   :  { %2505 = vset.pattern.permute.xlu0 %v2871_v56 }
  0xc6   :  { %v335_v61 = vunpack.c.l.b16 %v164_v58 }
  0xcb   :  { %v138_v59 = vpop.f32.mrf.mxu0  ;;  %v283_v10 = vpop.f32.mrf.mxu1 }
  0xcc   :  { %v165_v60 = vpack.c.bf16 %v138_v59, %v138_v59  ;;  %v305_v11 = vpack.c.bf16 %v283_v10, %v281_v3 }
  0xce   :  { %v336_v62 = vunpack.c.l.b16 %v165_v60  ;;  %2398 = vmatmul.msk.bf16.gmra.mxu3 %vm357_vm2, %v305_v11 }
  0xd0   :  { %v2995_v63 = vpack.c.b16 %v336_v62, %v335_v61 }
  0xd2   :  { %2390 = vmatmul.msk.bf16.gmra.mxu2 %vm357_vm2, %v2995_v63 }
  0xd3   :  { %v141_v2 = vpop.f32.mrf.mxu0  ;;  %v286_v13 = vpop.f32.mrf.mxu1 }
  0xd4   :  { %v166_v4 = vpack.c.bf16 %v141_v2, %v141_v2 }
  0xd6   :  { %v337_v7 = vunpack.c.l.b16 %v166_v4 }
  0xdb   :  { %v143_v5 = vpop.f32.mrf.mxu0  ;;  %v288_v20 = vpop.f32.mrf.mxu1 }
  0xdc   :  { %v167_v6 = vpack.c.bf16 %v143_v5, %v143_v5  ;;  %v306_v21 = vpack.c.bf16 %v288_v20, %v286_v13  ;;  %v2873_v20 = vmov 3  }
  0xde   :  { %v338_v8 = vunpack.c.l.b16 %v167_v6  ;;  %2399 = vmatmul.msk.bf16.gmra.mxu3 %vm357_vm2, %v306_v21  ;;  %v2872_v6 = vmov 0  }
  0xe0   :  { %v3000_v9 = vpack.c.b16 %v338_v8, %v337_v7 }
  0xe2   :  { %2391 = vmatmul.msk.bf16.gmra.mxu2 %vm357_vm2, %v3000_v9 }
  0xe3   :  { %v146_v12 = vpop.f32.mrf.mxu0  ;;  %v291_v23 = vpop.f32.mrf.mxu1 }
  0xe4   :  { %v168_v14 = vpack.c.bf16 %v146_v12, %v146_v12 }
  0xe6   :  { %v339_v17 = vunpack.c.l.b16 %v168_v14 }
  0xeb   :  { %v148_v15 = vpop.f32.mrf.mxu0  ;;  %v293_v31 = vpop.f32.mrf.mxu1 }
  0xec   :  { %v169_v16 = vpack.c.bf16 %v148_v15, %v148_v15  ;;  %v307_v32 = vpack.c.bf16 %v293_v31, %v291_v23 }
  0xee   :  { %v340_v18 = vunpack.c.l.b16 %v169_v16  ;;  %2400 = vmatmul.msk.bf16.gmra.mxu3 %vm357_vm2, %v307_v32 }
  0xf0   :  { %v3005_v19 = vpack.c.b16 %v340_v18, %v339_v17 }
  0xf2   :  { %2392 = vmatmul.msk.bf16.gmra.mxu2 %vm357_vm2, %v3005_v19 }
  0xf3   :  { %v151_v22 = vpop.f32.mrf.mxu0  ;;  %v296_v33 = vpop.f32.mrf.mxu1 }
  0xf4   :  { %v170_v24 = vpack.c.bf16 %v151_v22, %v151_v22 }
  0xf6   :  { %v341_v28 = vunpack.c.l.b16 %v170_v24 }
  0xfb   :  { %v153_v26 = vpop.f32.mrf.mxu0  ;;  %v298_v34 = vpop.f32.mrf.mxu1 }
  0xfc   :  { %v171_v27 = vpack.c.bf16 %v153_v26, %v153_v26  ;;  %v308_v36 = vpack.c.bf16 %v298_v34, %v296_v33 }
  0xfe   :  { %v342_v29 = vunpack.c.l.b16 %v171_v27  ;;  %2401 = vmatmul.msk.bf16.gmra.mxu3 %vm357_vm2, %v308_v36 }
 0x100   :  { %v3010_v30 = vpack.c.b16 %v342_v29, %v341_v28 }
 0x102   :  { %2393 = vmatmul.msk.bf16.gmra.mxu2 %vm357_vm2, %v3010_v30  ;;  %1201 = vmatpush.bf16.msrb.mxu1 %v3010_v30 }
 0x106   :  { %1202 = vmatpush.bf16.msrb.mxu1 %v3005_v19 }
 0x10a   :  { %1203 = vmatpush.bf16.msrb.mxu1 %v3000_v9 }
 0x10e   :  { %1204 = vmatpush.bf16.msrb.mxu1 %v2995_v63 }
 0x111   :  { %v464_v40 = vpop.f32.mrf.mxu3 }
 0x112   :  { %1205 = vmatpush.bf16.msrb.mxu1 %v2990_v53 }
 0x115   :  { %v391_v37 = vpop.f32.mrf.mxu2 }
 0x116   :  { %1206 = vmatpush.bf16.msrb.mxu1 %v2985_v43 }
 0x119   :  { %v466_v42 = vpop.f32.mrf.mxu3 }
 0x11a   :  { %1207 = vmatpush.bf16.msrb.mxu1 %v2980_v35  ;;  %v2506_v55 = vpack.i.bf16 %v466_v42, %v464_v40 }
 0x11c   :  { %2507 = vperm.xlu0 %2505, %v2506_v55  }
 0x11d   :  { %v393_v38 = vpop.f32.mrf.mxu2 }
 0x11e   :  { %1208 = vmatpush.bf16.msrb.mxu1 %v2976_v25  ;;  %v2555_v17 = vpack.i.bf16 %v393_v38, %v391_v37  ;;  %v504_v37 = vlaneseq }
 0x121   :  { %v469_v45 = vpop.f32.mrf.mxu3 }
 0x124   :  { %2511 = vset.pattern.permute.xlu0 %v2870_v48 }
 0x125   :  { %v396_v39 = vpop.f32.mrf.mxu2 }
 0x129   :  { %v471_v47 = vpop.f32.mrf.mxu3 }
 0x12a   :  { %v2582_v21 = vpack.i.bf16 %v471_v47, %v469_v45 }
 0x12d   :  { %v398_v41 = vpop.f32.mrf.mxu2 }
 0x12e   :  { %v2544_v2 = vpack.i.bf16 %v398_v41, %v396_v39  ;;  %v3048_v39 = vand.u32 127, %v504_v37 }
 0x130   :  { %vm506_vm3 = vcmp.eq.s32.totalorder %v3048_v39, 0 }
 0x131   :  { %v474_v50 = vpop.f32.mrf.mxu3 }
 0x135   :  { %v401_v44 = vpop.f32.mrf.mxu2 }
 0x139   :  { %v476_v52 = vpop.f32.mrf.mxu3 }
 0x13a   :  { %v2635_v22 = vpack.i.bf16 %v476_v52, %v474_v50 }
 0x13d   :  { %v403_v46 = vpop.f32.mrf.mxu2 }
 0x13e   :  { %v2539_v14 = vpack.i.bf16 %v403_v46, %v401_v44 }
 0x141   :  { %v479_v57 = vpop.f32.mrf.mxu3 }
 0x145   :  { %v406_v49 = vpop.f32.mrf.mxu2 }
 0x149   :  { %v481_v60 = vpop.f32.mrf.mxu3 }
 0x14a   :  { %v2645_v24 = vpack.i.bf16 %v481_v60, %v479_v57 }
 0x14d   :  { %v408_v51 = vpop.f32.mrf.mxu2 }
 0x14e   :  { %v2534_v62 = vpack.i.bf16 %v408_v51, %v406_v49 }
 0x151   :  { %v484_v0 = vpop.f32.mrf.mxu3 }
 0x155   :  { %v411_v54 = vpop.f32.mrf.mxu2 }
 0x159   :  { %v486_v3 = vpop.f32.mrf.mxu3 }
 0x15a   :  { %v2657_v4 = vpack.i.bf16 %v486_v3, %v484_v0 }
 0x15d   :  { %v413_v58 = vpop.f32.mrf.mxu2 }
 0x15e   :  { %v2577_v59 = vpack.i.bf16 %v413_v58, %v411_v54 }
 0x160   :  { %2530 = vperm.xlu2 %2528, %v2577_v59  }
 0x161   :  { %v489_v12 = vpop.f32.mrf.mxu3 }
 0x165   :  { %v416_v61 = vpop.f32.mrf.mxu2 }
 0x168   :  { %2535 = vperm.xlu2 %2528, %v2534_v62  }
 0x169   :  { %v491_v16 = vpop.f32.mrf.mxu3 }
 0x16a   :  { %v2662_v27 = vpack.i.bf16 %v491_v16, %v489_v12 }
 0x16d   :  { %v418_v1 = vpop.f32.mrf.mxu2 }
 0x16e   :  { %v2572_v11 = vpack.i.bf16 %v418_v1, %v416_v61 }
 0x170   :  { %2545 = vperm.xlu2 %2528, %v2544_v2  }
 0x171   :  { %v494_v18 = vpop.f32.mrf.mxu3 }
 0x175   :  { %v421_v5 = vpop.f32.mrf.mxu2 }
 0x178   :  { %2560 = vset.pattern.permute.xlu2 %v2872_v6 }
 0x179   :  { %v496_v23 = vpop.f32.mrf.mxu3 }
 0x17a   :  { %v2640_v31 = vpack.i.bf16 %v496_v23, %v494_v18 }
 0x17d   :  { %v423_v7 = vpop.f32.mrf.mxu2 }
 0x17e   :  { %v2561_v8 = vpack.i.bf16 %v423_v7, %v421_v5 }
 0x180   :  { %2562 = vperm.xlu2 %2560, %v2561_v8   ;;  %2519 = vperm.xlu1 %2517, %v2561_v8  }
 0x181   :  { %v499_v26 = vpop.f32.mrf.mxu3 }
 0x185   :  { %v426_v10 = vpop.f32.mrf.mxu2 }
 0x188   :  { %2573 = vperm.xlu2 %2560, %v2572_v11   ;;  %2524 = vperm.xlu1 %2517, %v2572_v11  }
 0x189   :  { %v501_v28 = vpop.f32.mrf.mxu3 }
 0x18a   :  { %v2672_v29 = vpack.i.bf16 %v501_v28, %v499_v26 }
 0x18d   :  { %v428_v13 = vpop.f32.mrf.mxu2 }
 0x18e   :  { %v2512_v15 = vpack.i.bf16 %v428_v13, %v426_v10  ;;  %v3046_v36 = vpop.permute.xlu0 %2507 }
 0x190   :  { %2588 = vperm.xlu2 %2560, %v2534_v62   ;;  %2540 = vperm.xlu1 %2517, %v2539_v14  }
 0x191   :  { %2513 = vperm.xlu0 %2511, %v2512_v15  }
 0x198   :  { %2603 = vperm.xlu2 %2560, %v2544_v2   ;;  %2556 = vperm.xlu1 %2517, %v2555_v17  }
 0x199   :  { %2549 = vset.pattern.permute.xlu0 %v2872_v6 }
 0x19a   :  { %2551 = vperm.xlu0 %2549, %v2512_v15  }
 0x1a0   :  { %2617 = vset.pattern.permute.xlu2 %v2873_v20  ;;  %2566 = vset.pattern.permute.xlu1 %v2873_v20 }
 0x1a1   :  { %2568 = vperm.xlu1 %2566, %v2506_v55   ;;  %2619 = vperm.xlu2 %2617, %v2657_v4  }
 0x1a2   :  { %2578 = vperm.xlu0 %2549, %v2577_v59  }
 0x1a9   :  { %2583 = vperm.xlu1 %2566, %v2582_v21   ;;  %2634 = vset.pattern.permute.xlu2 %v2871_v56 }
 0x1aa   :  { %2593 = vperm.xlu0 %2549, %v2539_v14   ;;  %2636 = vperm.xlu2 %2634, %v2635_v22  }
 0x1b1   :  { %2598 = vperm.xlu1 %2566, %v2635_v22  }
 0x1b2   :  { %2608 = vperm.xlu0 %2549, %v2555_v17   ;;  %2646 = vperm.xlu2 %2634, %v2645_v24  }
 0x1b9   :  { %2613 = vperm.xlu1 %2566, %v2645_v24  }
 0x1ba   :  { %2623 = vset.pattern.permute.xlu0 %v2871_v56  ;;  %2663 = vperm.xlu2 %2634, %v2662_v27   ;;  %v2531_v32 = vpop.permute.xlu2 %2530 }
 0x1bb   :  { %2625 = vperm.xlu0 %2623, %v2582_v21   ;;  %v2533_v11 = vunpack.i.h.bf16 %v2531_v32  ;;  %v2532_v12 = vunpack.i.l.bf16 %v2531_v32 }
 0x1bd   :  { %v1539_v18 = vsel %vm506_vm3, 1.0, %v2532_v12 }
 0x1c1   :  { %2630 = vperm.xlu1 %2566, %v2662_v27  }
 0x1c2   :  { %2673 = vperm.xlu2 %2634, %v2672_v29  }
 0x1c3   :  { %2650 = vset.pattern.permute.xlu0 %v2873_v20  ;;  %v1540_v20 = vsel %vm506_vm3, 1.0, %v2533_v11 }
 0x1c4   :  { %2652 = vperm.xlu0 %2650, %v2672_v29   ;;  %v1551_v26 = vpack.c.bf16 %v1540_v20, %v1539_v18 }
 0x1c9   :  { %2641 = vperm.xlu1 %2566, %v2640_v31  }
 0x1ca   :  { %2044 = vrot.lane.b32.xlu2 %v3005_v19, %s2874_s0  ;;  %v3042_v19 = vpop.permute.xlu2 %2535 }
 0x1cb   :  { %v2538_v27 = vunpack.i.h.bf16 %v3042_v19  ;;  %v2537_v28 = vunpack.i.l.bf16 %v3042_v19 }
 0x1cc   :  { %2042 = vrot.lane.b32.xlu0 %v3000_v9, %s2874_s0 }
 0x1cd   :  { %2677 = vset.pattern.permute.xlu0 %v2870_v48 }
 0x1d1   :  { %2656 = vset.pattern.permute.xlu1 %v2871_v56 }
 0x1d2   :  { %2658 = vperm.xlu1 %2656, %v2657_v4   ;;  %v3044_v9 = vpop.permute.xlu2 %2545 }
 0x1d4   :  { %2038 = vrot.lane.b32.xlu0 %v2990_v53, %s2874_s0 }
 0x1da   :  { %2668 = vperm.xlu1 %2656, %v2640_v31   ;;  %v2563_v38 = vpop.permute.xlu2 %2562 }
 0x1db   :  { %v2565_v59 = vunpack.i.h.bf16 %v2563_v38  ;;  %v2564_v60 = vunpack.i.l.bf16 %v2563_v38  ;;  %v1537_v38 = vsel %vm506_vm3, 1.0, %v2537_v28 }
 0x1dd   :  { %v703_v6 = vsel %vm506_vm3, 1.0, %v2564_v60  ;;  %v704_v7 = vsel %vm506_vm3, 1.0, %v2565_v59  ;;  %v2548_v59 = vunpack.i.h.bf16 %v3044_v9  ;;  %v2547_v60 = vunpack.i.l.bf16 %v3044_v9 }
 0x1de   :  { %v713_v13 = vpack.c.bf16 %v704_v7, %v703_v6 }
 0x1df   :  { %v1534_v6 = vsel %vm506_vm3, 1.0, %v2548_v59 }
 0x1e0   :  { %v759_v17 = vsel %vm715_vm4, %v713_v13, 0 }
 0x1e2   :  { %2046 = vrot.lane.b32.xlu1 %v3010_v30, %s2874_s0  ;;  %v2574_v48 = vpop.permute.xlu2 %2573 }
 0x1e3   :  { %v2576_v14 = vunpack.i.h.bf16 %v2574_v48  ;;  %v2575_v15 = vunpack.i.l.bf16 %v2574_v48 }
 0x1e5   :  { %v701_v22 = vsel %vm506_vm3, 1.0, %v2575_v15  ;;  %v702_v23 = vsel %vm506_vm3, 1.0, %v2576_v14 }
 0x1e6   :  { %v712_v31 = vpack.c.bf16 %v702_v23, %v701_v22 }
 0x1e8   :  { %v756_v37 = vsel %vm715_vm4, %v712_v31, 0 }
 0x1ea   :  { %2040 = vrot.lane.b32.xlu1 %v2995_v63, %s2874_s0  ;;  %v2589_v8 = vpop.permute.xlu2 %2588 }
 0x1eb   :  { %v2590_v48 = vunpack.i.l.bf16 %v2589_v8 }
 0x1f2   :  { %v2520_v33 = vpop.permute.xlu1 %2519  ;;  %v2604_v29 = vpop.permute.xlu2 %2603 }
 0x1f3   :  { %v2522_v63 = vunpack.i.h.bf16 %v2520_v33  ;;  %v2521_v42 = vunpack.i.l.bf16 %v2520_v33  ;;  %v2606_v14 = vunpack.i.h.bf16 %v2604_v29  ;;  %v2605_v15 = vunpack.i.l.bf16 %v2604_v29 }
 0x1f5   :  { %v1543_v50 = vsel %vm506_vm3, 1.0, %v2521_v42  ;;  %v1544_v51 = vsel %vm506_vm3, 1.0, %v2522_v63 }
 0x1f6   :  { %v1553_v56 = vpack.c.bf16 %v1544_v51, %v1543_v50 }
 0x1f8   :  { %v1598_v1 = vsel %vm715_vm4, %v1553_v56, 0 }
 0x1fa   :  { %v2525_v34 = vpop.permute.xlu1 %2524 }
 0x1fb   :  { %v2527_v57 = vunpack.i.h.bf16 %v2525_v34  ;;  %v2526_v58 = vunpack.i.l.bf16 %v2525_v34  ;;  %v1592_v34 = vsel %vm715_vm4, %v1551_v26, 0  ;;  %v3106_v42 = vpop.permute.xlu2 %2619 }
 0x1fd   :  { %v1541_v3 = vsel %vm506_vm3, 1.0, %v2526_v58  ;;  %v1542_v4 = vsel %vm506_vm3, 1.0, %v2527_v57 }
 0x1fe   :  { %v1552_v10 = vpack.c.bf16 %v1542_v4, %v1541_v3  ;;  %v1533_v4 = vsel %vm506_vm3, 1.0, %v2547_v60 }
 0x200   :  { %v1595_v16 = vsel %vm715_vm4, %v1552_v10, 0  ;;  %v1548_v10 = vpack.c.bf16 %v1534_v6, %v1533_v4 }
 0x202   :  { %v3050_v53 = vpop.permute.xlu1 %2540 }
 0x203   :  { %v2514_v40 = vpop.permute.xlu0 %2513 }
 0x204   :  { %v2516_v30 = vunpack.i.h.bf16 %v2514_v40  ;;  %v2515_v41 = vunpack.i.l.bf16 %v2514_v40  ;;  %v1538_v40 = vsel %vm506_vm3, 1.0, %v2538_v27 }
 0x205   :  { %v1550_v63 = vpack.c.bf16 %v1538_v40, %v1537_v38 }
 0x206   :  { %v1545_v44 = vsel %vm506_vm3, 1.0, %v2515_v41  ;;  %v1546_v45 = vsel %vm506_vm3, 1.0, %v2516_v30 }
 0x207   :  { %v1554_v46 = vpack.c.bf16 %v1546_v45, %v1545_v44  ;;  %v2543_v44 = vunpack.i.h.bf16 %v3050_v53  ;;  %v2542_v45 = vunpack.i.l.bf16 %v3050_v53  ;;  %v1589_v50 = vsel %vm715_vm4, %v1550_v63, 0 }
 0x208   :  { %v697_v53 = vsel %vm506_vm3, 1.0, %v2590_v48  ;;  %v2509_v48 = vunpack.i.l.bf16 %v3046_v36 }
 0x209   :  { %v1601_v47 = vsel %vm715_vm4, %v1554_v46, 0 }
 0x20a   :  { %1603 = vmatpush.bf16.xpose.msrb.mxu2 %v1601_v47  ;;  %v3058_v49 = vpop.permute.xlu1 %2556  ;;  %v2591_v47 = vunpack.i.h.bf16 %v2589_v8 }
 0x20b   :  { %v2559_v11 = vunpack.i.h.bf16 %v3058_v49  ;;  %v2558_v12 = vunpack.i.l.bf16 %v3058_v49  ;;  %v693_v49 = vsel %vm506_vm3, 1.0, %v2605_v15 }
 0x20c   :  { %v2552_v52 = vpop.permute.xlu0 %2551  ;;  %v698_v56 = vsel %vm506_vm3, 1.0, %v2591_v47  ;;  %v2510_v47 = vunpack.i.h.bf16 %v3046_v36 }
 0x20d   :  { %v2554_v54 = vunpack.i.h.bf16 %v2552_v52  ;;  %v2553_v55 = vunpack.i.l.bf16 %v2552_v52  ;;  %v1535_v52 = vsel %vm506_vm3, 1.0, %v2542_v45  ;;  %v1531_v20 = vsel %vm506_vm3, 1.0, %v2558_v12 }
 0x20e   :  { %v1532_v22 = vsel %vm506_vm3, 1.0, %v2559_v11 }
 0x20f   :  { %v705_v61 = vsel %vm506_vm3, 1.0, %v2553_v55  ;;  %v706_v62 = vsel %vm506_vm3, 1.0, %v2554_v54  ;;  %v1536_v54 = vsel %vm506_vm3, 1.0, %v2543_v44  ;;  %v1547_v27 = vpack.c.bf16 %v1532_v22, %v1531_v20 }
 0x210   :  { %v714_v0 = vpack.c.bf16 %v706_v62, %v705_v61  ;;  %v1549_v58 = vpack.c.bf16 %v1536_v54, %v1535_v52  ;;  %v710_v61 = vpack.c.bf16 %v698_v56, %v697_v53  ;;  %v588_v52 = vsel %vm506_vm3, %v2510_v47, 1.0 }
 0x211   :  { %v587_v54 = vsel %vm506_vm3, %v2509_v48, 1.0 }
 0x212   :  { %1604 = vmatpush.bf16.xpose.msrb.mxu2 %v1598_v1  ;;  %v762_v2 = vsel %vm715_vm4, %v714_v0, 0  ;;  %v3124_v1 = vpop.permute.xlu2 %2636  ;;  %v750_v3 = vsel %vm715_vm4, %v710_v61, 0  ;;  %v603_v56 = vpack.c.bf16 %v588_v52, %v587_v54 }
 0x213   :  { %764 = vmatpush.bf16.xpose.msrb.mxu0 %v762_v2  ;;  %v3074_v5 = vpop.permute.xlu1 %2568  ;;  %v1586_v2 = vsel %vm715_vm4, %v1549_v58, 0 }
 0x214   :  { %v2579_v24 = vpop.permute.xlu0 %2578 }
 0x215   :  { %v2581_v32 = vunpack.i.h.bf16 %v2579_v24  ;;  %v2580_v33 = vunpack.i.l.bf16 %v2579_v24  ;;  %v694_v24 = vsel %vm506_vm3, 1.0, %v2606_v14 }
 0x216   :  { %v708_v28 = vpack.c.bf16 %v694_v24, %v693_v49 }
 0x217   :  { %v699_v19 = vsel %vm506_vm3, 1.0, %v2580_v33  ;;  %v700_v41 = vsel %vm506_vm3, 1.0, %v2581_v32  ;;  %v2571_v32 = vunpack.i.h.bf16 %v3074_v5  ;;  %v2570_v33 = vunpack.i.l.bf16 %v3074_v5 }
 0x218   :  { %v711_v46 = vpack.c.bf16 %v700_v41, %v699_v19 }
 0x219   :  { %v1444_v19 = vsel %vm506_vm3, %v2571_v32, 1.0  ;;  %v1443_v41 = vsel %vm506_vm3, %v2570_v33, 1.0  ;;  %v2622_v32 = vunpack.i.h.bf16 %v3106_v42  ;;  %v2621_v33 = vunpack.i.l.bf16 %v3106_v42 }
 0x21a   :  { %1605 = vmatpush.bf16.xpose.msrb.mxu2 %v1595_v16  ;;  %v753_v51 = vsel %vm715_vm4, %v711_v46, 0  ;;  %v1583_v16 = vsel %vm715_vm4, %v1548_v10, 0  ;;  %v1459_v46 = vpack.c.bf16 %v1444_v19, %v1443_v41 }
 0x21b   :  { %765 = vmatpush.bf16.xpose.msrb.mxu0 %v759_v17  ;;  %v3086_v21 = vpop.permute.xlu1 %2583  ;;  %v3141_v17 = vpop.permute.xlu2 %2646 }
 0x21c   :  { %v2594_v57 = vpop.permute.xlu0 %2593  ;;  %v2585_v36 = vunpack.i.l.bf16 %v3086_v21 }
 0x21d   :  { %v2596_v62 = vunpack.i.h.bf16 %v2594_v57  ;;  %v2595_v0 = vunpack.i.l.bf16 %v2594_v57  ;;  %v2586_v57 = vunpack.i.h.bf16 %v3086_v21 }
 0x21e   :  { %v1445_v60 = vsel %vm506_vm3, %v2585_v36, 1.0 }
 0x21f   :  { %v695_v9 = vsel %vm506_vm3, 1.0, %v2595_v0  ;;  %v696_v8 = vsel %vm506_vm3, 1.0, %v2596_v62  ;;  %v1446_v59 = vsel %vm506_vm3, %v2586_v57, 1.0 }
 0x220   :  { %v709_v13 = vpack.c.bf16 %v696_v8, %v695_v9 }
 0x222   :  { %1606 = vmatpush.bf16.xpose.msrb.mxu2 %v1592_v34  ;;  %v747_v18 = vsel %vm715_vm4, %v709_v13, 0  ;;  %v1580_v34 = vsel %vm715_vm4, %v1547_v27, 0 }
 0x223   :  { %766 = vmatpush.bf16.xpose.msrb.mxu0 %v756_v37  ;;  %v3100_v30 = vpop.permute.xlu1 %2598  ;;  %v744_v37 = vsel %vm715_vm4, %v708_v28, 0  ;;  %v3166_v63 = vpop.permute.xlu2 %2663  ;;  %v2649_v28 = vunpack.i.h.bf16 %v3141_v17 }
 0x224   :  { %v2609_v26 = vpop.permute.xlu0 %2608  ;;  %v2601_v8 = vunpack.i.h.bf16 %v3100_v30  ;;  %v2600_v10 = vunpack.i.l.bf16 %v3100_v30  ;;  %v2666_v48 = vunpack.i.h.bf16 %v3166_v63 }
 0x225   :  { %v2611_v29 = vunpack.i.h.bf16 %v2609_v26  ;;  %v2610_v31 = vunpack.i.l.bf16 %v2609_v26 }
 0x226   :  { %v1448_v12 = vsel %vm506_vm3, %v2601_v8, 1.0  ;;  %v1447_v13 = vsel %vm506_vm3, %v2600_v10, 1.0  ;;  %v598_v54 = vsel %vm506_vm3, %v2666_v48, 1.0 }
 0x227   :  { %v691_v38 = vsel %vm506_vm3, 1.0, %v2610_v31  ;;  %v692_v40 = vsel %vm506_vm3, 1.0, %v2611_v29  ;;  %v1461_v15 = vpack.c.bf16 %v1448_v12, %v1447_v13  ;;  %v2648_v29 = vunpack.i.l.bf16 %v3141_v17 }
 0x228   :  { %v707_v45 = vpack.c.bf16 %v692_v40, %v691_v38  ;;  %v594_v31 = vsel %vm506_vm3, %v2649_v28, 1.0  ;;  %v1451_v38 = vsel %vm506_vm3, %v2621_v33, 1.0 }
 0x22a   :  { %1607 = vmatpush.bf16.xpose.msrb.mxu2 %v1589_v50  ;;  %v741_v50 = vsel %vm715_vm4, %v707_v45, 0 }
 0x22b   :  { %767 = vmatpush.bf16.xpose.msrb.mxu0 %v753_v51  ;;  %v3116_v55 = vpop.permute.xlu1 %2613  ;;  %v3180_v53 = vpop.permute.xlu2 %2673 }
 0x22c   :  { %v2616_v22 = vunpack.i.h.bf16 %v3116_v55  ;;  %v2615_v49 = vunpack.i.l.bf16 %v3116_v55  ;;  %v593_v55 = vsel %vm506_vm3, %v2648_v29, 1.0  ;;  %v2675_v8 = vunpack.i.l.bf16 %v3180_v53 }
 0x22d   :  { %v2626_v44 = vpop.permute.xlu0 %2625 }
 0x22e   :  { %v2628_v62 = vunpack.i.h.bf16 %v2626_v44  ;;  %v2627_v0 = vunpack.i.l.bf16 %v2626_v44  ;;  %v1450_v26 = vsel %vm506_vm3, %v2616_v22, 1.0 }
 0x230   :  { %v590_v4 = vsel %vm506_vm3, %v2628_v62, 1.0  ;;  %v589_v6 = vsel %vm506_vm3, %v2627_v0, 1.0 }
 0x231   :  { %v604_v9 = vpack.c.bf16 %v590_v4, %v589_v6 }
 0x232   :  { %1608 = vmatpush.bf16.xpose.msrb.mxu2 %v1586_v2  ;;  %v1460_v2 = vpack.c.bf16 %v1446_v59, %v1445_v60 }
 0x233   :  { %768 = vmatpush.bf16.xpose.msrb.mxu0 %v750_v3  ;;  %v3132_v7 = vpop.permute.xlu1 %2630  ;;  %v2045_v3 = vpop.permute.xlu2 %2044 }
 0x234   :  { %v2633_v45 = vunpack.i.h.bf16 %v3132_v7 }
 0x236   :  { %v3184_v58 = vpop.permute.xlu0 %2652  ;;  %v1454_v47 = vsel %vm506_vm3, %v2633_v45, 1.0 }
 0x23a   :  { %1609 = vmatpush.bf16.xpose.msrb.mxu2 %v1583_v16  ;;  %v2639_v16 = vunpack.i.h.bf16 %v3124_v1 }
 0x23b   :  { %769 = vmatpush.bf16.xpose.msrb.mxu0 %v747_v18  ;;  %v3148_v23 = vpop.permute.xlu1 %2641  ;;  %v2638_v18 = vunpack.i.l.bf16 %v3124_v1  ;;  %v1449_v1 = vsel %vm506_vm3, %v2615_v49, 1.0 }
 0x23c   :  { %v592_v30 = vsel %vm506_vm3, %v2639_v16, 1.0  ;;  %v1462_v27 = vpack.c.bf16 %v1450_v26, %v1449_v1  ;;  %v2644_v57 = vunpack.i.h.bf16 %v3148_v23  ;;  %v2643_v36 = vunpack.i.l.bf16 %v3148_v23 }
 0x23d   :  { %v591_v20 = vsel %vm506_vm3, %v2638_v18, 1.0 }
 0x23e   :  { %v2043_v21 = vpop.permute.xlu0 %2042  ;;  %v605_v24 = vpack.c.bf16 %v592_v30, %v591_v20  ;;  %v1456_v59 = vsel %vm506_vm3, %v2644_v57, 1.0 }
 0x242   :  { %1610 = vmatpush.bf16.xpose.msrb.mxu2 %v1580_v34  ;;  %v606_v34 = vpack.c.bf16 %v594_v31, %v593_v55 }
 0x243   :  { %770 = vmatpush.bf16.xpose.msrb.mxu0 %v744_v37  ;;  %v1452_v37 = vsel %vm506_vm3, %v2622_v32, 1.0 }
 0x244   :  { %v3168_v5 = vpop.permute.xlu1 %2658  ;;  %v1463_v17 = vpack.c.bf16 %v1452_v37, %v1451_v38 }
 0x245   :  { %v2661_v40 = vunpack.i.h.bf16 %v3168_v5  ;;  %v2660_v19 = vunpack.i.l.bf16 %v3168_v5 }
 0x246   :  { %v2039_v14 = vpop.permute.xlu0 %2038 }
 0x247   :  { %v596_v41 = vsel %vm506_vm3, %v2661_v40, 1.0  ;;  %v595_v42 = vsel %vm506_vm3, %v2660_v19, 1.0 }
 0x248   :  { %v607_v44 = vpack.c.bf16 %v596_v41, %v595_v42 }
 0x249   :  { %2442 = vmatmul.msk.bf16.vlgmr.msrb.gmra.mxu2 %vm715_vm4, %v1459_v46  ;;  %v2632_v46 = vunpack.i.l.bf16 %v3132_v7 }
 0x24b   :  { %771 = vmatpush.bf16.xpose.msrb.mxu0 %v741_v50  ;;  %v1453_v5 = vsel %vm506_vm3, %v2632_v46, 1.0  ;;  %v2665_v50 = vunpack.i.l.bf16 %v3166_v63  ;;  %v1455_v63 = vsel %vm506_vm3, %v2643_v36, 1.0 }
 0x24c   :  { %v3174_v51 = vpop.permute.xlu1 %2668  ;;  %v1464_v52 = vpack.c.bf16 %v1454_v47, %v1453_v5  ;;  %v1465_v60 = vpack.c.bf16 %v1456_v59, %v1455_v63 }
 0x24d   :  { %v597_v7 = vsel %vm506_vm3, %v2665_v50, 1.0  ;;  %v2670_v62 = vunpack.i.l.bf16 %v3174_v51 }
 0x24f   :  { %v599_v23 = vsel %vm506_vm3, %v2670_v62, 1.0 }
 0x252   :  { %2402 = vmatmul.msk.bf16.vlgmr.msrb.gmra.mxu0 %vm715_vm4, %v603_v56  ;;  %v608_v56 = vpack.c.bf16 %v598_v54, %v597_v7 }
 0x254   :  { %v2047_v61 = vpop.permute.xlu1 %2046 }
 0x255   :  { %2056 = vmatpush.bf16.msrb.mxu3 %v2047_v61  ;;  %v2671_v61 = vunpack.i.h.bf16 %v3174_v51 }
 0x257   :  { %v600_v0 = vsel %vm506_vm3, %v2671_v61, 1.0 }
 0x259   :  { %2443 = vmatmul.msk.bf16.gmra.mxu2 %vm715_vm4, %v1460_v2  ;;  %2057 = vmatpush.bf16.msrb.mxu3 %v2045_v3  ;;  %v2655_v2 = vunpack.i.h.bf16 %v3184_v58  ;;  %v2654_v3 = vunpack.i.l.bf16 %v3184_v58  ;;  %v601_v58 = vsel %vm506_vm3, %v2675_v8, 1.0 }
 0x25b   :  { %v1458_v4 = vsel %vm506_vm3, %v2655_v2, 1.0  ;;  %v1457_v6 = vsel %vm506_vm3, %v2654_v3, 1.0 }
 0x25c   :  { %v2041_v11 = vpop.permute.xlu1 %2040  ;;  %v1466_v51 = vpack.c.bf16 %v1458_v4, %v1457_v6 }
 0x25d   :  { %2058 = vmatpush.bf16.msrb.mxu3 %v2043_v21  ;;  %v609_v21 = vpack.c.bf16 %v600_v0, %v599_v23 }
 0x261   :  { %2059 = vmatpush.bf16.msrb.mxu3 %v2041_v11  ;;  %v1700_v11 = vld [vmem:[%s3813_s2] sm:$0xff] }
 0x262   :  { %2403 = vmatmul.msk.bf16.gmra.mxu0 %vm715_vm4, %v604_v9  ;;  %v2676_v9 = vunpack.i.h.bf16 %v3180_v53  ;;  %v1704_v13 = vunpack.c.0.s8 %v1700_v11  ;;  %v1705_v16 = vunpack.c.1.s8 %v1700_v11  ;;  %v867_v55 = vunpack.c.2.s8 %v1700_v11 }
 0x263   :  { %v868_v42 = vunpack.c.3.s8 %v1700_v11 }
 0x264   :  { %v602_v10 = vsel %vm506_vm3, %v2676_v9, 1.0  ;;  %v1721_v30 = vcvt.s32.f32 %v1705_v16  ;;  %v883_v38 = vcvt.s32.f32 %v867_v55 }
 0x265   :  { %2060 = vmatpush.bf16.msrb.mxu3 %v2039_v14  ;;  %v610_v12 = vpack.c.bf16 %v602_v10, %v601_v58  ;;  %v1720_v14 = vcvt.s32.f32 %v1704_v13  ;;  %v884_v48 = vcvt.s32.f32 %v868_v42 }
 0x266   :  { %v2451_v26 = vadd.f32 -1.0, %v1721_v30  ;;  %v2412_v41 = vadd.f32 -1.0, %v883_v38 }
 0x267   :  { %v2413_v57 = vadd.f32 -1.0, %v884_v48 }
 0x268   :  { %v1753_v29 = vmul.f32 1e+30, %v2451_v26  ;;  %v915_v5 = vmul.f32 1e+30, %v2412_v41 }
 0x269   :  { %2444 = vmatmul.msk.bf16.gmra.mxu2 %vm715_vm4, %v1461_v15  ;;  %v2450_v15 = vadd.f32 -1.0, %v1720_v14  ;;  %v916_v62 = vmul.f32 1e+30, %v2413_v57 }
 0x26b   :  { %v1752_v18 = vmul.f32 1e+30, %v2450_v15 }
 0x272   :  { %2404 = vmatmul.msk.bf16.gmra.mxu0 %vm715_vm4, %v605_v24 }
 0x279   :  { %2445 = vmatmul.msk.bf16.gmra.mxu2 %vm715_vm4, %v1462_v27 }
 0x282   :  { %2405 = vmatmul.msk.bf16.gmra.mxu0 %vm715_vm4, %v606_v34 }
 0x289   :  { %2446 = vmatmul.msk.bf16.gmra.mxu2 %vm715_vm4, %v1463_v17 }
 0x292   :  { %2406 = vmatmul.msk.bf16.gmra.mxu0 %vm715_vm4, %v607_v44  ;;  %v3299_v44 = vld [vmem:[%s3813_s2 + $0x8] sm:$0xff] }
 0x293   :  { %v1708_v47 = vunpack.c.0.s8 %v3299_v44  ;;  %v1709_v59 = vunpack.c.1.s8 %v3299_v44 }
 0x295   :  { %v1725_v3 = vcvt.s32.f32 %v1709_v59 }
 0x297   :  { %v2455_v8 = vadd.f32 -1.0, %v1725_v3 }
 0x299   :  { %2447 = vmatmul.msk.bf16.gmra.mxu2 %vm715_vm4, %v1464_v52 }
 0x2a2   :  { %2407 = vmatmul.msk.bf16.gmra.mxu0 %vm715_vm4, %v608_v56  ;;  %v1724_v56 = vcvt.s32.f32 %v1708_v47  ;;  %v1710_v47 = vunpack.c.2.s8 %v3299_v44 }
 0x2a4   :  { %v2454_v61 = vadd.f32 -1.0, %v1724_v56 }
 0x2a6   :  { %v1756_v6 = vmul.f32 1e+30, %v2454_v61 }
 0x2a9   :  { %2448 = vmatmul.msk.bf16.gmra.mxu2 %vm715_vm4, %v1465_v60 }
 0x2b2   :  { %2408 = vmatmul.msk.bf16.gmra.mxu0 %vm715_vm4, %v609_v21 }
 0x2b9   :  { %2449 = vmatmul.msk.bf16.gmra.mxu2 %vm715_vm4, %v1466_v51 }
 0x2c2   :  { %2409 = vmatmul.msk.bf16.gmra.mxu0 %vm715_vm4, %v610_v12 }
 0x2cc   :  { %v1612_v53 = vpop.f32.mrf.mxu2 }
 0x2cd   :  { %vm1652_vm5 = vcmp.gt.f32.partialorder %v1612_v53, 0.0  ;;  %v1668_v20 = vmul.f32 0.01, %v1612_v53 }
 0x2cf   :  { %v773_v22 = vpop.f32.mrf.mxu0  ;;  %v1684_v49 = vsel %vm1652_vm5, %v1612_v53, %v1668_v20  ;;  %v3319_v53 = vmul.f32 1e+30, %v2455_v8 }
 0x2d0   :  { %vm813_vm6 = vcmp.gt.f32.partialorder %v773_v22, 0.0  ;;  %v829_v39 = vmul.f32 0.01, %v773_v22  ;;  %v3284_v24 = vadd.f32 %v1752_v18, %v1684_v49 }
 0x2d2   :  { %1784 = vmax.xlane.f32.xlu0 %v3284_v24  ;;  %v845_v1 = vsel %vm813_vm6, %v773_v22, %v829_v39  ;;  %v1711_v22 = vunpack.c.3.s8 %v3299_v44 }
 0x2d3   :  { %v3287_v27 = vadd.f32 %v1752_v18, %v845_v1 }
 0x2d4   :  { %v1614_v28 = vpop.f32.mrf.mxu2  ;;  %v1727_v39 = vcvt.s32.f32 %v1711_v22 }
 0x2d5   :  { %vm1653_vm7 = vcmp.gt.f32.partialorder %v1614_v28, 0.0  ;;  %v1669_v31 = vmul.f32 0.01, %v1614_v28  ;;  %945 = vmax.xlane.f32.xlu2 %v3287_v27 }
 0x2d6   :  { %v2457_v26 = vadd.f32 -1.0, %v1727_v39 }
 0x2d7   :  { %v775_v32 = vpop.f32.mrf.mxu0  ;;  %v1685_v33 = vsel %vm1653_vm7, %v1614_v28, %v1669_v31  ;;  %v3332_v31 = vld [vmem:[%s3813_s2 + $0x10] sm:$0xff] }
 0x2d8   :  { %vm814_vm8 = vcmp.gt.f32.partialorder %v775_v32, 0.0  ;;  %v830_v34 = vmul.f32 0.01, %v775_v32  ;;  %v3290_v37 = vadd.f32 %v1753_v29, %v1685_v33  ;;  %v3327_v28 = vmul.f32 1e+30, %v2457_v26 }
 0x2d9   :  { %v1713_v33 = vunpack.c.1.s8 %v3332_v31  ;;  %v1714_v59 = vunpack.c.2.s8 %v3332_v31 }
 0x2da   :  { %1786 = vmax.xlane.f32.xlu1 %v3290_v37  ;;  %v846_v17 = vsel %vm814_vm8, %v775_v32, %v830_v34 }
 0x2db   :  { %v3293_v40 = vadd.f32 %v1753_v29, %v846_v17  ;;  %v1729_v38 = vcvt.s32.f32 %v1713_v33  ;;  %v1730_v44 = vcvt.s32.f32 %v1714_v59 }
 0x2dc   :  { %v1617_v19 = vpop.f32.mrf.mxu2 }
 0x2dd   :  { %947 = vmax.xlane.f32.xlu0 %v3293_v40  ;;  %v1670_v54 = vmul.f32 0.01, %v1617_v19  ;;  %vm1654_vm10 = vcmp.gt.f32.partialorder %v1617_v19, 0.0  ;;  %v2459_v17 = vadd.f32 -1.0, %v1729_v38  ;;  %v2460_v3 = vadd.f32 -1.0, %v1730_v44 }
 0x2df   :  { %v778_v45 = vpop.f32.mrf.mxu0  ;;  %v1686_v60 = vsel %vm1654_vm10, %v1617_v19, %v1670_v54  ;;  %v3341_v41 = vmul.f32 1e+30, %v2459_v17 }
 0x2e0   :  { %vm815_vm9 = vcmp.gt.f32.partialorder %v778_v45, 0.0  ;;  %v831_v46 = vmul.f32 0.01, %v778_v45  ;;  %v3308_v2 = vadd.f32 %v1686_v60, %v915_v5 }
 0x2e2   :  { %v847_v50 = vsel %vm815_vm9, %v778_v45, %v831_v46 }
 0x2e3   :  { %v3302_v52 = vadd.f32 %v915_v5, %v847_v50  ;;  %v1726_v5 = vcvt.s32.f32 %v1710_v47 }
 0x2e4   :  { %v1619_v7 = vpop.f32.mrf.mxu2 }
 0x2e5   :  { %949 = vmax.xlane.f32.xlu2 %v3302_v52  ;;  %v1671_v21 = vmul.f32 0.01, %v1619_v7  ;;  %vm1655_vm12 = vcmp.gt.f32.partialorder %v1619_v7, 0.0  ;;  %v2456_v48 = vadd.f32 -1.0, %v1726_v5 }
 0x2e7   :  { %v780_v36 = vpop.f32.mrf.mxu0  ;;  %v1687_v11 = vsel %vm1655_vm12, %v1619_v7, %v1671_v21  ;;  %v3351_v54 = vmul.f32 1e+30, %v2456_v48 }
 0x2e8   :  { %vm816_vm11 = vcmp.gt.f32.partialorder %v780_v36, 0.0  ;;  %v832_v63 = vmul.f32 0.01, %v780_v36  ;;  %v3315_v14 = vadd.f32 %v1687_v11, %v916_v62 }
 0x2ea   :  { %v848_v0 = vsel %vm816_vm11, %v780_v36, %v832_v63 }
 0x2eb   :  { %v3306_v23 = vadd.f32 %v916_v62, %v848_v0 }
 0x2ec   :  { %v1622_v4 = vpop.f32.mrf.mxu2 }
 0x2ed   :  { %vm1656_vm13 = vcmp.gt.f32.partialorder %v1622_v4, 0.0  ;;  %v1672_v51 = vmul.f32 0.01, %v1622_v4  ;;  %951 = vmax.xlane.f32.xlu1 %v3306_v23  ;;  %1788 = vmax.xlane.f32.xlu2 %v3308_v2 }
 0x2ef   :  { %v1688_v9 = vsel %vm1656_vm13, %v1622_v4, %v1672_v51  ;;  %v783_v10 = vpop.f32.mrf.mxu0 }
 0x2f0   :  { %v3312_v58 = vadd.f32 %v1756_v6, %v1688_v9  ;;  %vm817_vm14 = vcmp.gt.f32.partialorder %v783_v10, 0.0  ;;  %v833_v12 = vmul.f32 0.01, %v783_v10 }
 0x2f2   :  { %1792 = vmax.xlane.f32.xlu0 %v3312_v58  ;;  %v849_v13 = vsel %vm817_vm14, %v783_v10, %v833_v12 }
 0x2f3   :  { %v3317_v15 = vadd.f32 %v1756_v6, %v849_v13  ;;  %v3364_v6 = vmul.f32 1e+30, %v2460_v3 }
 0x2f4   :  { %v1624_v16 = vpop.f32.mrf.mxu2 }
 0x2f5   :  { %vm1657_vm15 = vcmp.gt.f32.partialorder %v1624_v16, 0.0  ;;  %v1673_v18 = vmul.f32 0.01, %v1624_v16  ;;  %1790 = vmax.xlane.f32.xlu2 %v3315_v14 }
 0x2f7   :  { %v1689_v30 = vsel %vm1657_vm15, %v1624_v16, %v1673_v18  ;;  %v785_v62 = vpop.f32.mrf.mxu0 }
 0x2f8   :  { %v3323_v20 = vadd.f32 %v3319_v53, %v1689_v30  ;;  %v834_v4 = vmul.f32 0.01, %v785_v62  ;;  %vm818_vm5 = vcmp.gt.f32.partialorder %v785_v62, 0.0 }
 0x2fa   :  { %1794 = vmax.xlane.f32.xlu1 %v3323_v20  ;;  %v850_v9 = vsel %vm818_vm5, %v785_v62, %v834_v4  ;;  %v3401_v4 = vld [vmem:[%s3813_s2 + $0x18] sm:$0xff]  ;;  %s2875_s2 = smov 8  }
 0x2fb   :  { %v3372_v12 = vadd.f32 %v3319_v53, %v850_v9  ;;  %v1715_v53 = vunpack.c.3.s8 %v3332_v31 }
 0x2fc   :  { %v1627_v49 = vpop.f32.mrf.mxu2 }
 0x2fd   :  { %v1674_v50 = vmul.f32 0.01, %v1627_v49  ;;  %vm1658_vm2 = vcmp.gt.f32.partialorder %v1627_v49, 0.0 }
 0x2ff   :  { %v1690_v56 = vsel %vm1658_vm2, %v1627_v49, %v1674_v50 }
 0x300   :  { %v3354_v57 = vadd.f32 %v3351_v54, %v1690_v56  ;;  %v788_v56 = vpop.f32.mrf.mxu0 }
 0x301   :  { %vm819_vm7 = vcmp.gt.f32.partialorder %v788_v56, 0.0 }
 0x304   :  { %v1629_v1 = vpop.f32.mrf.mxu2 }
 0x305   :  { %vm1659_vm0 = vcmp.gt.f32.partialorder %v1629_v1, 0.0  ;;  %v1675_v29 = vmul.f32 0.01, %v1629_v1 }
 0x307   :  { %v1691_v55 = vsel %vm1659_vm0, %v1629_v1, %v1675_v29 }
 0x308   :  { %v3335_v32 = vadd.f32 %v3327_v28, %v1691_v55 }
 0x30a   :  { %1798 = vmax.xlane.f32.xlu0 %v3335_v32 }
 0x30c   :  { %v1632_v34 = vpop.f32.mrf.mxu2 }
 0x30d   :  { %2036 = vrot.lane.b32.xlu2 %v2985_v43, %s2874_s0  ;;  %v1712_v43 = vunpack.c.0.s8 %v3332_v31  ;;  %v1676_v63 = vmul.f32 0.01, %v1632_v34  ;;  %vm1660_vm3 = vcmp.gt.f32.partialorder %v1632_v34, 0.0 }
 0x30f   :  { %v1728_v7 = vcvt.s32.f32 %v1712_v43  ;;  %v1692_v60 = vsel %vm1660_vm3, %v1632_v34, %v1676_v63  ;;  %v1731_v34 = vcvt.s32.f32 %v1715_v53 }
 0x311   :  { %v2458_v36 = vadd.f32 -1.0, %v1728_v7 }
 0x314   :  { %v1634_v19 = vpop.f32.mrf.mxu2 }
 0x315   :  { %vm1661_vm1 = vcmp.gt.f32.partialorder %v1634_v19, 0.0  ;;  %v1677_v42 = vmul.f32 0.01, %v1634_v19 }
 0x317   :  { %v1693_v45 = vsel %vm1661_vm1, %v1634_v19, %v1677_v42  ;;  %v2461_v42 = vadd.f32 -1.0, %v1731_v34 }
 0x318   :  { %v3344_v46 = vadd.f32 %v3341_v41, %v1693_v45 }
 0x319   :  { %v3388_v31 = vmul.f32 1e+30, %v2461_v42 }
 0x31a   :  { %1802 = vmax.xlane.f32.xlu1 %v3344_v46 }
 0x31c   :  { %v1637_v61 = vpop.f32.mrf.mxu2 }
 0x31d   :  { %v1678_v21 = vmul.f32 0.01, %v1637_v61  ;;  %vm1662_vm4 = vcmp.gt.f32.partialorder %v1637_v61, 0.0 }
 0x31e   :  { %2032 = vrot.lane.b32.xlu0 %v2976_v25, %s2874_s0  ;;  %v3358_v25 = vmul.f32 1e+30, %v2458_v36 }
 0x31f   :  { %v1694_v51 = vsel %vm1662_vm4, %v1637_v61, %v1678_v21 }
 0x320   :  { %v3361_v0 = vadd.f32 %v3358_v25, %v1692_v60  ;;  %v3367_v8 = vadd.f32 %v3364_v6, %v1694_v51 }
 0x324   :  { %v1639_v17 = vpop.f32.mrf.mxu2 }
 0x325   :  { %v1679_v45 = vmul.f32 0.01, %v1639_v17  ;;  %vm1663_vm6 = vcmp.gt.f32.partialorder %v1639_v17, 0.0 }
 0x327   :  { %v1695_v43 = vsel %vm1663_vm6, %v1639_v17, %v1679_v45 }
 0x328   :  { %v3393_v59 = vadd.f32 %v3388_v31, %v1695_v43 }
 0x32c   :  { %v1642_v3 = vpop.f32.mrf.mxu2 }
 0x32d   :  { %v1680_v45 = vmul.f32 0.01, %v1642_v3  ;;  %vm1664_vm8 = vcmp.gt.f32.partialorder %v1642_v3, 0.0 }
 0x334   :  { %v1644_v34 = vpop.f32.mrf.mxu2 }
 0x335   :  { %vm1665_vm9 = vcmp.gt.f32.partialorder %v1644_v34, 0.0 }
 0x336   :  { %1796 = vmax.xlane.f32.xlu2 %v3354_v57 }
 0x33e   :  { %1800 = vmax.xlane.f32.xlu2 %v3361_v0 }
 0x345   :  { %v1785_v10 = vpop.xlane.xlu0 %1784 }
 0x346   :  { %v1816_v11 = vsub.f32 %v3284_v24, %v1785_v10  ;;  %1804 = vmax.xlane.f32.xlu2 %v3367_v8  ;;  %v3403_v10 = vpop.f32.mrf.mxu0 }
 0x347   :  { %vm820_vm12 = vcmp.gt.f32.partialorder %v3403_v10, 0.0 }
 0x348   :  { %v1832_v13 = vpack.c.bf16 %v1816_v11, %v1816_v11  ;;  %955 = vmax.xlane.f32.xlu0 %v3372_v12  ;;  %v3376_v49 = vpop.xlane.xlu2 %945 }
 0x34a   :  { %v1848_v16 = vunpack.c.l.bf16 %v1832_v13 }
 0x34c   :  { %v1864_v18 = vmul.f32 1.442695, %v1848_v16 }
 0x34d   :  { %v1787_v30 = vpop.xlane.xlu1 %1786 }
 0x34e   :  { %2678 = vpow2.f32 %v1864_v18  ;;  %v1817_v22 = vsub.f32 %v3290_v37, %v1787_v30  ;;  %v1717_v18 = vunpack.c.1.s8 %v3401_v4  ;;  %v835_v30 = vmul.f32 0.01, %v788_v56 }
 0x350   :  { %v1833_v39 = vpack.c.bf16 %v1817_v22, %v1817_v22  ;;  %v948_v13 = vpop.xlane.xlu0 %947  ;;  %v851_v53 = vsel %vm819_vm7, %v788_v56, %v835_v30 }
 0x351   :  { %v978_v22 = vsub.f32 %v3293_v40, %v948_v13 }
 0x352   :  { %v1849_v26 = vunpack.c.l.bf16 %v1833_v39 }
 0x354   :  { %v2679_v1 = vpop.eup %2678  ;;  %v1866_v24 = vmul.f32 1.442695, %v1849_v26 }
 0x355   :  { %v1896_v29 = vpack.c.bf16 %v2679_v1, %v2679_v1 }
 0x356   :  { %2680 = vpow2.f32 %v1866_v24  ;;  %v1733_v24 = vcvt.s32.f32 %v1717_v18 }
 0x357   :  { %v3378_v55 = vunpack.c.l.bf16 %v1896_v29 }
 0x358   :  { %v3381_v33 = vpop.xlane.xlu2 %949  ;;  %v2463_v40 = vadd.f32 -1.0, %v1733_v24 }
 0x359   :  { %1928 = vadd.xlane.f32.xlu1 %v3378_v55 }
 0x35a   :  { %v3422_v56 = vmul.f32 1e+30, %v2463_v40 }
 0x35c   :  { %v2681_v38 = vpop.eup %2680 }
 0x35d   :  { %v1897_v37 = vpack.c.bf16 %v2681_v38, %v2681_v38  ;;  %v793_v38 = vpop.f32.mrf.mxu0 }
 0x35e   :  { %vm821_vm11 = vcmp.gt.f32.partialorder %v793_v38, 0.0 }
 0x35f   :  { %v3384_v19 = vunpack.c.l.bf16 %v1897_v37 }
 0x360   :  { %v1789_v47 = vpop.xlane.xlu2 %1788  ;;  %v3390_v50 = vpop.xlane.xlu1 %951 }
 0x361   :  { %v1818_v5 = vsub.f32 %v3308_v2, %v1789_v47  ;;  %1930 = vadd.xlane.f32.xlu0 %v3384_v19  ;;  %v3416_v47 = vadd.f32 %v3351_v54, %v851_v53 }
 0x363   :  { %v1834_v48 = vpack.c.bf16 %v1818_v5, %v1818_v5  ;;  %v1681_v5 = vmul.f32 0.01, %v1644_v34 }
 0x365   :  { %v1850_v7 = vunpack.c.l.bf16 %v1834_v48 }
 0x367   :  { %v1868_v36 = vmul.f32 1.442695, %v1850_v7  ;;  %v1696_v7 = vsel %vm1664_vm8, %v1642_v3, %v1680_v45 }
 0x368   :  { %v1791_v63 = vpop.xlane.xlu2 %1790 }
 0x369   :  { %v1819_v44 = vsub.f32 %v3315_v14, %v1791_v63  ;;  %1806 = vmax.xlane.f32.xlu0 %v3393_v59  ;;  %2682 = vpow2.f32 %v1868_v36  ;;  %v1697_v36 = vsel %vm1665_vm9, %v1644_v34, %v1681_v5 }
 0x36b   :  { %v1835_v2 = vpack.c.bf16 %v1819_v44, %v1819_v44 }
 0x36d   :  { %v1851_v60 = vunpack.c.l.bf16 %v1835_v2  ;;  %v1795_v61 = vpop.xlane.xlu1 %1794  ;;  %v795_v2 = vpop.f32.mrf.mxu0 }
 0x36e   :  { %v1821_v62 = vsub.f32 %v3323_v20, %v1795_v61  ;;  %v1716_v20 = vunpack.c.0.s8 %v3401_v4  ;;  %v838_v61 = vmul.f32 0.01, %v795_v2  ;;  %vm822_vm10 = vcmp.gt.f32.partialorder %v795_v2, 0.0 }
 0x36f   :  { %v1870_v21 = vmul.f32 1.442695, %v1851_v60  ;;  %v2683_v51 = vpop.eup %2682  ;;  %v3428_v60 = vadd.f32 %v3422_v56, %v1697_v36 }
 0x370   :  { %v2037_v9 = vpop.permute.xlu2 %2036  ;;  %v1837_v14 = vpack.c.bf16 %v1821_v62, %v1821_v62  ;;  %v1898_v11 = vpack.c.bf16 %v2683_v51, %v2683_v51  ;;  %v1732_v26 = vcvt.s32.f32 %v1716_v20  ;;  %v854_v3 = vsel %vm822_vm10, %v795_v2, %v838_v61  ;;  %v3440_v20 = vpop.f32.mrf.mxu2 }
 0x371   :  { %2684 = vpow2.f32 %v1870_v21  ;;  %2061 = vmatpush.bf16.msrb.mxu3 %v2037_v9  ;;  %v1793_v21 = vpop.xlane.xlu0 %1792  ;;  %vm1666_vm14 = vcmp.gt.f32.partialorder %v3440_v20, 0.0  ;;  %vm1362_vm10 = vcmask 60416  }
 0x372   :  { %2034 = vrot.lane.b32.xlu1 %v2980_v35, %s2874_s0  ;;  %v3408_v16 = vunpack.c.l.bf16 %v1898_v11  ;;  %v1853_v39 = vunpack.c.l.bf16 %v1837_v14  ;;  %v994_v35 = vpack.c.bf16 %v978_v22, %v978_v22  ;;  %v2462_v42 = vadd.f32 -1.0, %v1732_v26 }
 0x373   :  { %v3435_v14 = vadd.f32 %v3341_v41, %v854_v3  ;;  %v1820_v11 = vsub.f32 %v3312_v58, %v1793_v21  ;;  %v837_v22 = vmul.f32 0.01, %v793_v38  ;;  %v1719_v41 = vunpack.c.3.s8 %v3401_v4 }
 0x374   :  { %1932 = vadd.xlane.f32.xlu0 %v3408_v16  ;;  %v1874_v17 = vmul.f32 1.442695, %v1853_v39  ;;  %v1010_v48 = vunpack.c.l.bf16 %v994_v35  ;;  %v3420_v43 = vmul.f32 1e+30, %v2462_v42  ;;  %v977_v39 = vsub.f32 %v3287_v27, %v3376_v49 }
 0x375   :  { %v1836_v18 = vpack.c.bf16 %v1820_v11, %v1820_v11 }
 0x376   :  { %2686 = vpow2.f32 %v1874_v17  ;;  %v1027_v63 = vmul.f32 1.442695, %v1010_v48  ;;  %v3425_v54 = vadd.f32 %v3420_v43, %v1696_v7  ;;  %v993_v58 = vpack.c.bf16 %v977_v39, %v977_v39 }
 0x377   :  { %v2685_v1 = vpop.eup %2684  ;;  %v1852_v26 = vunpack.c.l.bf16 %v1836_v18  ;;  %v836_v17 = vmul.f32 0.01, %v3403_v10 }
 0x378   :  { %v1899_v29 = vpack.c.bf16 %v2685_v1, %v2685_v1  ;;  %2688 = vpow2.f32 %v1027_v63  ;;  %v853_v1 = vsel %vm821_vm11, %v793_v38, %v837_v22  ;;  %v1649_v24 = vpop.f32.mrf.mxu2  ;;  %v1009_v27 = vunpack.c.l.bf16 %v993_v58 }
 0x379   :  { %v1872_v53 = vmul.f32 1.442695, %v1852_v26  ;;  %v3449_v35 = vadd.f32 %v3358_v25, %v853_v1  ;;  %v1683_v42 = vmul.f32 0.01, %v1649_v24  ;;  %vm1667_vm13 = vcmp.gt.f32.partialorder %v1649_v24, 0.0 }
 0x37a   :  { %v3413_v37 = vunpack.c.l.bf16 %v1899_v29  ;;  %v1735_v29 = vcvt.s32.f32 %v1719_v41  ;;  %v852_v40 = vsel %vm820_vm12, %v3403_v10, %v836_v17  ;;  %v1025_v25 = vmul.f32 1.442695, %v1009_v27 }
 0x37b   :  { %2690 = vpow2.f32 %v1872_v53  ;;  %v1699_v45 = vsel %vm1667_vm13, %v1649_v24, %v1683_v42  ;;  %v3460_v7 = vadd.f32 %v3327_v28, %v852_v40  ;;  %v979_v10 = vsub.f32 %v3302_v52, %v3381_v33 }
 0x37c   :  { %1934 = vadd.xlane.f32.xlu2 %v3413_v37  ;;  %957 = vmax.xlane.f32.xlu0 %v3416_v47  ;;  %v2687_v44 = vpop.eup %2686  ;;  %v2465_v49 = vadd.f32 -1.0, %v1735_v29  ;;  %2692 = vpow2.f32 %v1025_v25 }
 0x37d   :  { %v1901_v62 = vpack.c.bf16 %v2687_v44, %v2687_v44  ;;  %v1799_v34 = vpop.xlane.xlu0 %1798  ;;  %v995_v3 = vpack.c.bf16 %v979_v10, %v979_v10 }
 0x37e   :  { %v2689_v9 = vpop.eup %2688  ;;  %v1823_v38 = vsub.f32 %v3335_v32, %v1799_v34  ;;  %v3457_v5 = vmul.f32 1e+30, %v2465_v49  ;;  %v3483_v34 = vpop.f32.mrf.mxu0 }
 0x37f   :  { %v3432_v51 = vunpack.c.l.bf16 %v1901_v62  ;;  %v1058_v13 = vpack.c.bf16 %v2689_v9, %v2689_v9  ;;  %v1011_v22 = vunpack.c.l.bf16 %v995_v3  ;;  %vm823_vm0 = vcmp.gt.f32.partialorder %v3483_v34, 0.0 }
 0x380   :  { %v1839_v48 = vpack.c.bf16 %v1823_v38, %v1823_v38  ;;  %v3463_v36 = vadd.f32 %v3457_v5, %v1699_v45 }
 0x381   :  { %v3442_v30 = vunpack.c.l.bf16 %v1058_v13  ;;  %v2691_v63 = vpop.eup %2690  ;;  %v980_v13 = vsub.f32 %v3306_v23, %v3390_v50  ;;  %v1718_v50 = vunpack.c.2.s8 %v3401_v4  ;;  %v1682_v4 = vmul.f32 0.01, %v3440_v20 }
 0x382   :  { %v1855_v32 = vunpack.c.l.bf16 %v1839_v48  ;;  %v1900_v44 = vpack.c.bf16 %v2691_v63, %v2691_v63  ;;  %v2693_v62 = vpop.eup %2692 }
 0x383   :  { %v1057_v18 = vpack.c.bf16 %v2693_v62, %v2693_v62  ;;  %v996_v41 = vpack.c.bf16 %v980_v13, %v980_v13  ;;  %v1734_v45 = vcvt.s32.f32 %v1718_v50 }
 0x384   :  { %1808 = vmax.xlane.f32.xlu2 %v3425_v54  ;;  %1810 = vmax.xlane.f32.xlu0 %v3428_v60  ;;  %v1878_v2 = vmul.f32 1.442695, %v1855_v32  ;;  %v3470_v21 = vunpack.c.l.bf16 %v1900_v44 }
 0x385   :  { %v3476_v1 = vunpack.c.l.bf16 %v1057_v18  ;;  %v2464_v62 = vadd.f32 -1.0, %v1734_v45 }
 0x386   :  { %2694 = vpow2.f32 %v1878_v2 }
 0x387   :  { %v3496_v18 = vmul.f32 1e+30, %v2464_v62 }
 0x38c   :  { %1938 = vadd.xlane.f32.xlu2 %v3432_v51  ;;  %963 = vmax.xlane.f32.xlu0 %v3435_v14  ;;  %v2695_v29 = vpop.eup %2694 }
 0x38d   :  { %v1803_v9 = vpop.xlane.xlu1 %1802  ;;  %v1903_v27 = vpack.c.bf16 %v2695_v29, %v2695_v29 }
 0x38e   :  { %v1825_v52 = vsub.f32 %v3344_v46, %v1803_v9  ;;  %v1012_v46 = vunpack.c.l.bf16 %v996_v41  ;;  %v1698_v9 = vsel %vm1666_vm14, %v3440_v20, %v1682_v4 }
 0x38f   :  { %v3486_v32 = vunpack.c.l.bf16 %v1903_v27 }
 0x390   :  { %v1841_v58 = vpack.c.bf16 %v1825_v52, %v1825_v52  ;;  %v3479_v53 = vpop.permute.xlu0 %2032  ;;  %v1031_v40 = vmul.f32 1.442695, %v1012_v46 }
 0x392   :  { %v1857_v17 = vunpack.c.l.bf16 %v1841_v58 }
 0x394   :  { %1091 = vadd.xlane.f32.xlu2 %v3442_v30  ;;  %v1882_v48 = vmul.f32 1.442695, %v1857_v17 }
 0x39c   :  { %953 = vmax.xlane.f32.xlu1 %v3317_v15  ;;  %961 = vmax.xlane.f32.xlu2 %v3449_v35 }
 0x3a4   :  { %959 = vmax.xlane.f32.xlu1 %v3460_v7  ;;  %1814 = vmax.xlane.f32.xlu2 %v3463_v36 }
 0x3a9   :  { %v1797_v61 = vpop.xlane.xlu2 %1796 }
 0x3aa   :  { %v1822_v28 = vsub.f32 %v3354_v57, %v1797_v61  ;;  %v1029_v57 = vmul.f32 1.442695, %v1011_v22 }
 0x3ac   :  { %v1838_v11 = vpack.c.bf16 %v1822_v28, %v1822_v28  ;;  %1936 = vadd.xlane.f32.xlu1 %v3470_v21  ;;  %v800_v28 = vpop.f32.mrf.mxu0 }
 0x3ad   :  { %v840_v58 = vmul.f32 0.01, %v800_v28  ;;  %vm824_vm15 = vcmp.gt.f32.partialorder %v800_v28, 0.0 }
 0x3ae   :  { %v1854_v33 = vunpack.c.l.bf16 %v1838_v11 }
 0x3b0   :  { %v1876_v39 = vmul.f32 1.442695, %v1854_v33 }
 0x3b1   :  { %v1801_v26 = vpop.xlane.xlu2 %1800 }
 0x3b2   :  { %2696 = vpow2.f32 %v1876_v39  ;;  %v1824_v24 = vsub.f32 %v3361_v0, %v1801_v26  ;;  %v3499_v39 = vadd.f32 %v3496_v18, %v1698_v9 }
 0x3b3   :  { %2698 = vpow2.f32 %v1029_v57 }
 0x3b4   :  { %v1840_v23 = vpack.c.bf16 %v1824_v24, %v1824_v24  ;;  %1089 = vadd.xlane.f32.xlu1 %v3476_v1  ;;  %v803_v50 = vpop.f32.mrf.mxu0 }
 0x3b5   :  { %v841_v62 = vmul.f32 0.01, %v803_v50  ;;  %vm825_vm2 = vcmp.gt.f32.partialorder %v803_v50, 0.0 }
 0x3b6   :  { %v1856_v42 = vunpack.c.l.bf16 %v1840_v23  ;;  %v856_v23 = vsel %vm824_vm15, %v800_v28, %v840_v58 }
 0x3b7   :  { %v857_v9 = vsel %vm825_vm2, %v803_v50, %v841_v62 }
 0x3b8   :  { %v2697_v49 = vpop.eup %2696  ;;  %v1880_v38 = vmul.f32 1.442695, %v1856_v42  ;;  %v839_v42 = vmul.f32 0.01, %v3483_v34 }
 0x3b9   :  { %v1805_v0 = vpop.xlane.xlu2 %1804  ;;  %v1902_v25 = vpack.c.bf16 %v2697_v49, %v2697_v49  ;;  %v2699_v2 = vpop.eup %2698  ;;  %v3514_v49 = vadd.f32 %v3388_v31, %v856_v23 }
 0x3ba   :  { %2700 = vpow2.f32 %v1880_v38  ;;  %v1826_v63 = vsub.f32 %v3367_v8, %v1805_v0  ;;  %v1059_v11 = vpack.c.bf16 %v2699_v2, %v2699_v2  ;;  %v855_v45 = vsel %vm823_vm0, %v3483_v34, %v839_v42 }
 0x3bb   :  { %v956_v10 = vpop.xlane.xlu0 %955  ;;  %v3489_v44 = vunpack.c.l.bf16 %v1902_v25  ;;  %2702 = vpow2.f32 %v1031_v40  ;;  %v3522_v0 = vadd.f32 %v3364_v6, %v855_v45 }
 0x3bc   :  { %v1842_v61 = vpack.c.bf16 %v1826_v63, %v1826_v63  ;;  %1942 = vadd.xlane.f32.xlu1 %v3486_v32  ;;  %v982_v3 = vsub.f32 %v3372_v12, %v956_v10  ;;  %2704 = vpow2.f32 %v1882_v48  ;;  %v3501_v26 = vunpack.c.l.bf16 %v1059_v11  ;;  %v805_v48 = vpop.f32.mrf.mxu0 }
 0x3bd   :  { %1940 = vadd.xlane.f32.xlu0 %v3489_v44  ;;  %v842_v63 = vmul.f32 0.01, %v805_v48  ;;  %vm826_vm1 = vcmp.gt.f32.partialorder %v805_v48, 0.0 }
 0x3be   :  { %v1858_v8 = vunpack.c.l.bf16 %v1842_v61  ;;  %v998_v22 = vpack.c.bf16 %v982_v3, %v982_v3 }
 0x3bf   :  { %v858_v34 = vsel %vm826_vm1, %v805_v48, %v842_v63 }
 0x3c0   :  { %v2701_v13 = vpop.eup %2700  ;;  %v1884_v33 = vmul.f32 1.442695, %v1858_v8  ;;  %v1014_v20 = vunpack.c.l.bf16 %v998_v22  ;;  %v3531_v3 = vadd.f32 %v3422_v56, %v858_v34 }
 0x3c1   :  { %v1904_v52 = vpack.c.bf16 %v2701_v13, %v2701_v13  ;;  %v2703_v41 = vpop.eup %2702 }
 0x3c2   :  { %v2705_v57 = vpop.eup %2704  ;;  %2706 = vpow2.f32 %v1884_v33  ;;  %v1060_v24 = vpack.c.bf16 %v2703_v41, %v2703_v41  ;;  %v1035_v46 = vmul.f32 1.442695, %v1014_v20 }
 0x3c3   :  { %v3503_v12 = vunpack.c.l.bf16 %v1904_v52  ;;  %v1905_v29 = vpack.c.bf16 %v2705_v57, %v2705_v57  ;;  %v3536_v52 = vadd.f32 %v3420_v43, %v857_v9 }
 0x3c4   :  { %1812 = vmax.xlane.f32.xlu1 %v3499_v39  ;;  %v3508_v17 = vunpack.c.l.bf16 %v1060_v24  ;;  %2708 = vpow2.f32 %v1035_v46 }
 0x3c5   :  { %1093 = vadd.xlane.f32.xlu0 %v3501_v26  ;;  %1944 = vadd.xlane.f32.xlu2 %v3503_v12  ;;  %v3511_v27 = vunpack.c.l.bf16 %v1905_v29 }
 0x3c8   :  { %v2707_v38 = vpop.eup %2706 }
 0x3c9   :  { %v1906_v40 = vpack.c.bf16 %v2707_v38, %v2707_v38 }
 0x3ca   :  { %v2709_v25 = vpop.eup %2708 }
 0x3cb   :  { %v3524_v31 = vunpack.c.l.bf16 %v1906_v40  ;;  %v1062_v2 = vpack.c.bf16 %v2709_v25, %v2709_v25  ;;  %v3545_v25 = vpop.f32.mrf.mxu0 }
 0x3cc   :  { %1095 = vadd.xlane.f32.xlu1 %v3508_v17  ;;  %v1929_v4 = vpop.xlane.xlu1 %1928  ;;  %vm827_vm4 = vcmp.gt.f32.partialorder %v3545_v25, 0.0 }
 0x3cd   :  { %1946 = vadd.xlane.f32.xlu0 %v3511_v27  ;;  %967 = vmax.xlane.f32.xlu2 %v3514_v49  ;;  %v3528_v61 = vunpack.c.l.bf16 %v1062_v2 }
 0x3d3   :  { %v810_v2 = vpop.f32.mrf.mxu0 }
 0x3d4   :  { %v1931_v10 = vpop.xlane.xlu0 %1930  ;;  %965 = vmax.xlane.f32.xlu1 %v3522_v0  ;;  %vm828_vm3 = vcmp.gt.f32.partialorder %v810_v2, 0.0 }
 0x3d5   :  { %2710 = vrcp.f32 %v1931_v10  ;;  %1948 = vadd.xlane.f32.xlu2 %v3524_v31 }
 0x3d6   :  { %2712 = vrcp.f32 %v1929_v4 }
 0x3db   :  { %v2711_v6 = vpop.eup %2710 }
 0x3dc   :  { %1099 = vadd.xlane.f32.xlu1 %v3528_v61  ;;  %v2713_v8 = vpop.eup %2712  ;;  %v1977_v28 = vpack.c.bf16 %v2711_v6, %v2711_v6  ;;  %v1807_v13 = vpop.xlane.xlu0 %1806 }
 0x3dd   :  { %971 = vmax.xlane.f32.xlu2 %v3531_v3  ;;  %v1976_v11 = vpack.c.bf16 %v2713_v8, %v2713_v8 }
 0x3de   :  { %v1993_v22 = vunpack.c.l.bf16 %v1977_v28 }
 0x3df   :  { %v1992_v33 = vunpack.c.l.bf16 %v1976_v11 }
 0x3e0   :  { %v2009_v56 = vmul.f32 %v1993_v22, %v3384_v19 }
 0x3e1   :  { %v2008_v57 = vmul.f32 %v1992_v33, %v3378_v55 }
 0x3e3   :  { %v2024_v20 = vpack.c.bf16 %v2009_v56, %v2008_v57 }
 0x3e4   :  { %v2035_v41 = vpop.permute.xlu1 %2034  ;;  %969 = vmax.xlane.f32.xlu1 %v3536_v52 }
 0x3e5   :  { %2062 = vmatpush.bf16.msrb.mxu3 %v2035_v41 }
 0x3e7   :  { %v1933_v58 = vpop.xlane.xlu0 %1932 }
 0x3e8   :  { %2714 = vrcp.f32 %v1933_v58 }
 0x3e9   :  { %2063 = vmatpush.bf16.msrb.mxu3 %v3479_v53 }
 0x3ec   :  { %2064 = vmatmul.bf16.vlgmr.msrb.gmra.mxu3 %v2024_v20 }
 0x3ee   :  { %v2715_v29 = vpop.eup %2714 }
 0x3ef   :  { %v1935_v24 = vpop.xlane.xlu2 %1934  ;;  %v1978_v43 = vpack.c.bf16 %v2715_v29, %v2715_v29  ;;  %v958_v4 = vpop.xlane.xlu0 %957 }
 0x3f0   :  { %2716 = vrcp.f32 %v1935_v24  ;;  %v983_v57 = vsub.f32 %v3416_v47, %v958_v4 }
 0x3f1   :  { %v1994_v50 = vunpack.c.l.bf16 %v1978_v43 }
 0x3f2   :  { %v999_v24 = vpack.c.bf16 %v983_v57, %v983_v57 }
 0x3f3   :  { %v2010_v55 = vmul.f32 %v1994_v50, %v3408_v16  ;;  %v1827_v16 = vsub.f32 %v3393_v59, %v1807_v13 }
 0x3f5   :  { %v1843_v8 = vpack.c.bf16 %v1827_v16, %v1827_v16 }
 0x3f6   :  { %v2717_v23 = vpop.eup %2716 }
 0x3f7   :  { %v1979_v46 = vpack.c.bf16 %v2717_v23, %v2717_v23  ;;  %v1809_v42 = vpop.xlane.xlu2 %1808  ;;  %v1811_v28 = vpop.xlane.xlu0 %1810  ;;  %v1859_v41 = vunpack.c.l.bf16 %v1843_v8  ;;  %v1015_v23 = vunpack.c.l.bf16 %v999_v24 }
 0x3f8   :  { %v1828_v38 = vsub.f32 %v3425_v54, %v1809_v42  ;;  %v844_v54 = vmul.f32 0.01, %v810_v2 }
 0x3f9   :  { %v1995_v45 = vunpack.c.l.bf16 %v1979_v46  ;;  %v1886_v13 = vmul.f32 1.442695, %v1859_v41 }
 0x3fa   :  { %v1844_v19 = vpack.c.bf16 %v1828_v38, %v1828_v38 }
 0x3fb   :  { %v2011_v40 = vmul.f32 %v1995_v45, %v3413_v37  ;;  %v860_v37 = vsel %vm828_vm3, %v810_v2, %v844_v54 }
 0x3fc   :  { %v1860_v53 = vunpack.c.l.bf16 %v1844_v19  ;;  %v3553_v22 = vadd.f32 %v3457_v5, %v860_v37  ;;  %v1829_v5 = vsub.f32 %v3428_v60, %v1811_v28 }
 0x3fd   :  { %v2025_v48 = vpack.c.bf16 %v2011_v40, %v2010_v55  ;;  %v1037_v40 = vmul.f32 1.442695, %v1015_v23 }
 0x3fe   :  { %v1888_v63 = vmul.f32 1.442695, %v1860_v53  ;;  %v1845_v45 = vpack.c.bf16 %v1829_v5, %v1829_v5 }
 0x3ff   :  { %2069 = vmatmul.bf16.gmra.mxu3 %v2025_v48  ;;  %v1939_v6 = vpop.xlane.xlu2 %1938  ;;  %v964_v43 = vpop.xlane.xlu0 %963 }
 0x400   :  { %2718 = vpow2.f32 %v1888_v63  ;;  %v986_v50 = vsub.f32 %v3435_v14, %v964_v43  ;;  %v1861_v60 = vunpack.c.l.bf16 %v1845_v45 }
 0x402   :  { %v1002_v53 = vpack.c.bf16 %v986_v50, %v986_v50  ;;  %v1890_v54 = vmul.f32 1.442695, %v1861_v60 }
 0x404   :  { %v1018_v14 = vunpack.c.l.bf16 %v1002_v53 }
 0x406   :  { %v2719_v10 = vpop.eup %2718 }
 0x407   :  { %v1908_v34 = vpack.c.bf16 %v2719_v10, %v2719_v10  ;;  %v1092_v56 = vpop.xlane.xlu2 %1091 }
 0x409   :  { %v3547_v62 = vunpack.c.l.bf16 %v1908_v34 }
 0x40b   :  { %1952 = vadd.xlane.f32.xlu2 %v3547_v62 }
 0x40f   :  { %v954_v9 = vpop.xlane.xlu1 %953  ;;  %v962_v42 = vpop.xlane.xlu2 %961 }
 0x410   :  { %v981_v11 = vsub.f32 %v3317_v15, %v954_v9  ;;  %v985_v4 = vsub.f32 %v3449_v35, %v962_v42  ;;  %v1043_v9 = vmul.f32 1.442695, %v1018_v14  ;;  %v843_v35 = vmul.f32 0.01, %v3545_v25 }
 0x412   :  { %v997_v33 = vpack.c.bf16 %v981_v11, %v981_v11  ;;  %v1001_v11 = vpack.c.bf16 %v985_v4, %v985_v4 }
 0x413   :  { %975 = vmax.xlane.f32.xlu2 %v3553_v22 }
 0x414   :  { %v1013_v58 = vunpack.c.l.bf16 %v997_v33  ;;  %v1017_v24 = vunpack.c.l.bf16 %v1001_v11 }
 0x416   :  { %v1033_v59 = vmul.f32 1.442695, %v1013_v58 }
 0x417   :  { %v960_v20 = vpop.xlane.xlu1 %959  ;;  %v1815_v16 = vpop.xlane.xlu2 %1814 }
 0x418   :  { %2720 = vpow2.f32 %v1033_v59  ;;  %v984_v29 = vsub.f32 %v3460_v7, %v960_v20  ;;  %v1831_v59 = vsub.f32 %v3463_v36, %v1815_v16  ;;  %v859_v36 = vsel %vm827_vm4, %v3545_v25, %v843_v35 }
 0x419   :  { %2722 = vpow2.f32 %v1886_v13  ;;  %vm2281_vm4 = vcmask 126016  }
 0x41a   :  { %v1000_v15 = vpack.c.bf16 %v984_v29, %v984_v29  ;;  %2724 = vrcp.f32 %v1939_v6  ;;  %v1847_v23 = vpack.c.bf16 %v1831_v59, %v1831_v59 }
 0x41c   :  { %v1016_v46 = vunpack.c.l.bf16 %v1000_v15  ;;  %v1863_v53 = vunpack.c.l.bf16 %v1847_v23 }
 0x41e   :  { %v2721_v47 = vpop.eup %2720  ;;  %v1039_v38 = vmul.f32 1.442695, %v1016_v46 }
 0x41f   :  { %v1937_v19 = vpop.xlane.xlu1 %1936  ;;  %v1061_v55 = vpack.c.bf16 %v2721_v47, %v2721_v47  ;;  %v2723_v7 = vpop.eup %2722 }
 0x420   :  { %2726 = vpow2.f32 %v1039_v38  ;;  %v2725_v63 = vpop.eup %2724  ;;  %v1907_v2 = vpack.c.bf16 %v2723_v7, %v2723_v7  ;;  %v1041_v38 = vmul.f32 1.442695, %v1017_v24 }
 0x421   :  { %2728 = vrcp.f32 %v1092_v56  ;;  %v3560_v48 = vunpack.c.l.bf16 %v1061_v55  ;;  %v1981_v10 = vpack.c.bf16 %v2725_v63, %v2725_v63 }
 0x422   :  { %2730 = vrcp.f32 %v1937_v19  ;;  %v3564_v56 = vunpack.c.l.bf16 %v1907_v2 }
 0x423   :  { %1097 = vadd.xlane.f32.xlu0 %v3560_v48  ;;  %2732 = vpow2.f32 %v1037_v40  ;;  %v1997_v33 = vunpack.c.l.bf16 %v1981_v10  ;;  %v1894_v10 = vmul.f32 1.442695, %v1863_v53 }
 0x425   :  { %v2013_v43 = vmul.f32 %v1997_v33, %v3432_v51  ;;  %v3579_v51 = vadd.f32 %v3496_v18, %v859_v36 }
 0x426   :  { %v2727_v34 = vpop.eup %2726 }
 0x427   :  { %v2729_v6 = vpop.eup %2728  ;;  %v1090_v37 = vpop.xlane.xlu1 %1089  ;;  %v1064_v8 = vpack.c.bf16 %v2727_v34, %v2727_v34 }
 0x428   :  { %v2731_v28 = vpop.eup %2730  ;;  %2734 = vrcp.f32 %v1090_v37  ;;  %v1138_v13 = vpack.c.bf16 %v2729_v6, %v2729_v6 }
 0x429   :  { %v1980_v41 = vpack.c.bf16 %v2731_v28, %v2731_v28  ;;  %v3566_v57 = vunpack.c.l.bf16 %v1064_v8  ;;  %v2733_v58 = vpop.eup %2732  ;;  %2736 = vpow2.f32 %v1890_v54 }
 0x42a   :  { %2738 = vpow2.f32 %v1043_v9  ;;  %v1063_v15 = vpack.c.bf16 %v2733_v58, %v2733_v58  ;;  %v1154_v50 = vunpack.c.l.bf16 %v1138_v13 }
 0x42b   :  { %v1996_v20 = vunpack.c.l.bf16 %v1980_v41  ;;  %1950 = vadd.xlane.f32.xlu0 %v3564_v56  ;;  %1103 = vadd.xlane.f32.xlu1 %v3566_v57 }
 0x42c   :  { %v3576_v40 = vunpack.c.l.bf16 %v1063_v15  ;;  %v1170_v25 = vmul.f32 %v1154_v50, %v3442_v30 }
 0x42d   :  { %v2012_v29 = vmul.f32 %v1996_v20, %v3470_v21 }
 0x42e   :  { %v2735_v5 = vpop.eup %2734 }
 0x42f   :  { %v1137_v46 = vpack.c.bf16 %v2735_v5, %v2735_v5  ;;  %v1943_v42 = vpop.xlane.xlu1 %1942  ;;  %v2026_v47 = vpack.c.bf16 %v2013_v43, %v2012_v29  ;;  %v2737_v19 = vpop.eup %2736 }
 0x430   :  { %2740 = vrcp.f32 %v1943_v42  ;;  %v1941_v45 = vpop.xlane.xlu0 %1940  ;;  %v2739_v21 = vpop.eup %2738  ;;  %v1909_v60 = vpack.c.bf16 %v2737_v19, %v2737_v19 }
 0x431   :  { %v1153_v55 = vunpack.c.l.bf16 %v1137_v46  ;;  %2074 = vmatmul.bf16.gmra.mxu3 %v2026_v47  ;;  %2742 = vrcp.f32 %v1941_v45  ;;  %v1066_v14 = vpack.c.bf16 %v2739_v21, %v2739_v21 }
 0x432   :  { %2744 = vpow2.f32 %v1041_v38  ;;  %v3586_v37 = vunpack.c.l.bf16 %v1909_v60 }
 0x433   :  { %v1169_v7 = vmul.f32 %v1153_v55, %v3476_v1  ;;  %1101 = vadd.xlane.f32.xlu0 %v3576_v40  ;;  %973 = vmax.xlane.f32.xlu1 %v3579_v51  ;;  %v3588_v8 = vunpack.c.l.bf16 %v1066_v14  ;;  %2746 = vpow2.f32 %v1894_v10 }
 0x435   :  { %v1185_v63 = vpack.c.bf16 %v1170_v25, %v1169_v7 }
 0x436   :  { %v2741_v4 = vpop.eup %2740 }
 0x437   :  { %v2743_v2 = vpop.eup %2742  ;;  %v1983_v34 = vpack.c.bf16 %v2741_v4, %v2741_v4  ;;  %1209 = vmatmul.bf16.vlgmr.msrb.gmra.mxu1 %v1185_v63  ;;  %v1813_v18 = vpop.xlane.xlu1 %1812 }
 0x438   :  { %v1982_v6 = vpack.c.bf16 %v2743_v2, %v2743_v2  ;;  %v1830_v54 = vsub.f32 %v3499_v39, %v1813_v18  ;;  %v1094_v30 = vpop.xlane.xlu0 %1093  ;;  %v1945_v16 = vpop.xlane.xlu2 %1944 }
 0x439   :  { %v1999_v1 = vunpack.c.l.bf16 %v1983_v34  ;;  %v2745_v28 = vpop.eup %2744  ;;  %2748 = vrcp.f32 %v1094_v30 }
 0x43a   :  { %v1998_v9 = vunpack.c.l.bf16 %v1982_v6  ;;  %v1846_v11 = vpack.c.bf16 %v1830_v54, %v1830_v54  ;;  %2750 = vrcp.f32 %v1945_v16  ;;  %v1065_v58 = vpack.c.bf16 %v2745_v28, %v2745_v28  ;;  %v2747_v20 = vpop.eup %2746 }
 0x43b   :  { %1954 = vadd.xlane.f32.xlu0 %v3586_v37  ;;  %1107 = vadd.xlane.f32.xlu1 %v3588_v8  ;;  %v2015_v33 = vmul.f32 %v1999_v1, %v3486_v32  ;;  %v1911_v36 = vpack.c.bf16 %v2747_v20, %v2747_v20 }
 0x43c   :  { %v1862_v41 = vunpack.c.l.bf16 %v1846_v11  ;;  %v2014_v39 = vmul.f32 %v1998_v9, %v3489_v44  ;;  %v3595_v5 = vunpack.c.l.bf16 %v1065_v58 }
 0x43d   :  { %v3601_v7 = vunpack.c.l.bf16 %v1911_v36 }
 0x43e   :  { %v1892_v35 = vmul.f32 1.442695, %v1862_v41  ;;  %v2027_v59 = vpack.c.bf16 %v2015_v33, %v2014_v39 }
 0x43f   :  { %v1096_v13 = vpop.xlane.xlu1 %1095  ;;  %v2749_v43 = vpop.eup %2748 }
 0x440   :  { %2752 = vpow2.f32 %v1892_v35  ;;  %v1947_v24 = vpop.xlane.xlu0 %1946  ;;  %v968_v29 = vpop.xlane.xlu2 %967  ;;  %v1139_v44 = vpack.c.bf16 %v2749_v43, %v2749_v43 }
 0x441   :  { %2754 = vrcp.f32 %v1096_v13  ;;  %2079 = vmatmul.bf16.gmra.mxu3 %v2027_v59  ;;  %v988_v15 = vsub.f32 %v3514_v49, %v968_v29  ;;  %v2751_v32 = vpop.eup %2750 }
 0x442   :  { %2756 = vrcp.f32 %v1947_v24  ;;  %v1984_v50 = vpack.c.bf16 %v2751_v32, %v2751_v32  ;;  %v1155_v21 = vunpack.c.l.bf16 %v1139_v44 }
 0x443   :  { %v1004_v23 = vpack.c.bf16 %v988_v15, %v988_v15  ;;  %1105 = vadd.xlane.f32.xlu0 %v3595_v5 }
 0x444   :  { %v2000_v63 = vunpack.c.l.bf16 %v1984_v50  ;;  %v1171_v18 = vmul.f32 %v1155_v21, %v3501_v26 }
 0x445   :  { %v1020_v46 = vunpack.c.l.bf16 %v1004_v23 }
 0x446   :  { %v2753_v42 = vpop.eup %2752  ;;  %v2016_v6 = vmul.f32 %v2000_v63, %v3503_v12 }
 0x447   :  { %v2755_v47 = vpop.eup %2754  ;;  %v1047_v38 = vmul.f32 1.442695, %v1020_v46  ;;  %v966_v45 = vpop.xlane.xlu1 %965  ;;  %v1910_v19 = vpack.c.bf16 %v2753_v42, %v2753_v42 }
 0x448   :  { %v2757_v55 = vpop.eup %2756  ;;  %v1140_v53 = vpack.c.bf16 %v2755_v47, %v2755_v47  ;;  %v987_v49 = vsub.f32 %v3522_v0, %v966_v45  ;;  %v3599_v25 = vpop.xlane.xlu2 %1948 }
 0x449   :  { %v1985_v60 = vpack.c.bf16 %v2757_v55, %v2757_v55  ;;  %2758 = vpow2.f32 %v1047_v38  ;;  %v3603_v14 = vunpack.c.l.bf16 %v1910_v19 }
 0x44a   :  { %v1156_v4 = vunpack.c.l.bf16 %v1140_v53  ;;  %v1003_v10 = vpack.c.bf16 %v987_v49, %v987_v49 }
 0x44b   :  { %v2001_v2 = vunpack.c.l.bf16 %v1985_v60  ;;  %1956 = vadd.xlane.f32.xlu2 %v3603_v14  ;;  %1958 = vadd.xlane.f32.xlu0 %v3601_v7 }
 0x44c   :  { %v1019_v34 = vunpack.c.l.bf16 %v1003_v10  ;;  %v1172_v0 = vmul.f32 %v1156_v4, %v3508_v17 }
 0x44d   :  { %v2017_v54 = vmul.f32 %v2001_v2, %v3511_v27 }
 0x44e   :  { %v1045_v30 = vmul.f32 1.442695, %v1019_v34  ;;  %v1186_v16 = vpack.c.bf16 %v1172_v0, %v1171_v18 }
 0x44f   :  { %v2759_v1 = vpop.eup %2758  ;;  %v1100_v28 = vpop.xlane.xlu1 %1099  ;;  %v2028_v9 = vpack.c.bf16 %v2017_v54, %v2016_v6 }
 0x450   :  { %2760 = vpow2.f32 %v1045_v30  ;;  %1214 = vmatmul.bf16.gmra.mxu1 %v1186_v16  ;;  %v972_v11 = vpop.xlane.xlu2 %971  ;;  %v1068_v33 = vpack.c.bf16 %v2759_v1, %v2759_v1 }
 0x451   :  { %2084 = vmatmul.bf16.gmra.mxu3 %v2028_v9  ;;  %v990_v41 = vsub.f32 %v3531_v3, %v972_v11 }
 0x452   :  { %v3612_v39 = vunpack.c.l.bf16 %v1068_v33 }
 0x453   :  { %v1006_v26 = vpack.c.bf16 %v990_v41, %v990_v41 }
 0x454   :  { %1111 = vadd.xlane.f32.xlu2 %v3612_v39 }
 0x455   :  { %v1022_v12 = vunpack.c.l.bf16 %v1006_v26 }
 0x456   :  { %v2761_v17 = vpop.eup %2760 }
 0x457   :  { %v1051_v27 = vmul.f32 1.442695, %v1022_v12  ;;  %v970_v58 = vpop.xlane.xlu1 %969  ;;  %v1067_v35 = vpack.c.bf16 %v2761_v17, %v2761_v17 }
 0x458   :  { %v989_v59 = vsub.f32 %v3536_v52, %v970_v58 }
 0x459   :  { %2762 = vpow2.f32 %v1051_v27  ;;  %v3616_v13 = vunpack.c.l.bf16 %v1067_v35 }
 0x45a   :  { %v1005_v20 = vpack.c.bf16 %v989_v59, %v989_v59 }
 0x45b   :  { %1109 = vadd.xlane.f32.xlu1 %v3616_v13 }
 0x45c   :  { %v1021_v24 = vunpack.c.l.bf16 %v1005_v20 }
 0x45e   :  { %v1049_v3 = vmul.f32 1.442695, %v1021_v24 }
 0x45f   :  { %v2763_v29 = vpop.eup %2762 }
 0x460   :  { %2764 = vpow2.f32 %v1049_v3  ;;  %v1070_v43 = vpack.c.bf16 %v2763_v29, %v2763_v29 }
 0x462   :  { %v3619_v15 = vunpack.c.l.bf16 %v1070_v43 }
 0x464   :  { %1115 = vadd.xlane.f32.xlu1 %v3619_v15 }
 0x466   :  { %v2765_v32 = vpop.eup %2764 }
 0x467   :  { %v1069_v23 = vpack.c.bf16 %v2765_v32, %v2765_v32 }
 0x469   :  { %v3622_v44 = vunpack.c.l.bf16 %v1069_v23 }
 0x46b   :  { %1113 = vadd.xlane.f32.xlu0 %v3622_v44 }
 0x46f   :  { %v2065_v52 = vpop.f32.mrf.mxu3 }
 0x470   :  { %v2121_v36 = vmin.f32 %v2065_v52, 0.0  ;;  %vm2105_vm5 = vcmp.gt.f32.partialorder %v2065_v52, 0.0 }
 0x472   :  { %v2137_v50 = vmul.f32 1.442695, %v2121_v36 }
 0x474   :  { %2766 = vpow2.f32 %v2137_v50 }
 0x477   :  { %v3625_v42 = vpop.f32.mrf.mxu3 }
 0x478   :  { %vm2106_vm12 = vcmp.gt.f32.partialorder %v3625_v42, 0.0 }
 0x47a   :  { %v2767_v46 = vpop.eup %2766 }
 0x47b   :  { %v2466_v47 = vadd.f32 -1.0, %v2767_v46 }
 0x47d   :  { %v2185_v38 = vsel %vm2105_vm5, %v2065_v52, %v2466_v47 }
 0x47e   :  { %v2201_v45 = vpack.c.bf16 %v2185_v38, %v2185_v38  ;;  %v3627_v19 = vpop.xlane.xlu2 %1952 }
 0x480   :  { %2233 = vrot.lane.b32.xlu1 %v2201_v45, %s2875_s2 }
 0x482   :  { %v2070_v55 = vpop.f32.mrf.mxu3 }
 0x483   :  { %v2123_v34 = vmin.f32 %v2070_v55, 0.0  ;;  %vm2107_vm7 = vcmp.gt.f32.partialorder %v2070_v55, 0.0 }
 0x485   :  { %v2141_v1 = vmul.f32 1.442695, %v2123_v34 }
 0x486   :  { %v976_v21 = vpop.xlane.xlu2 %975 }
 0x487   :  { %v992_v53 = vsub.f32 %v3553_v22, %v976_v21 }
 0x489   :  { %v1008_v49 = vpack.c.bf16 %v992_v53, %v992_v53 }
 0x48a   :  { %v2072_v63 = vpop.f32.mrf.mxu3 }
 0x48b   :  { %v1024_v60 = vunpack.c.l.bf16 %v1008_v49  ;;  %v2124_v4 = vmin.f32 %v2072_v63, 0.0  ;;  %vm2108_vm6 = vcmp.gt.f32.partialorder %v2072_v63, 0.0 }
 0x48d   :  { %v1055_v10 = vmul.f32 1.442695, %v1024_v60  ;;  %v2143_v2 = vmul.f32 1.442695, %v2124_v4 }
 0x48f   :  { %2768 = vpow2.f32 %v1055_v10 }
 0x490   :  { %2770 = vpow2.f32 %v2143_v2 }
 0x491   :  { %2772 = vrcp.f32 %v1100_v28 }
 0x495   :  { %v2769_v18 = vpop.eup %2768 }
 0x496   :  { %v2771_v0 = vpop.eup %2770  ;;  %v1098_v6 = vpop.xlane.xlu0 %1097  ;;  %v1072_v54 = vpack.c.bf16 %v2769_v18, %v2769_v18 }
 0x497   :  { %v2773_v30 = vpop.eup %2772  ;;  %v2469_v16 = vadd.f32 -1.0, %v2771_v0  ;;  %2774 = vrcp.f32 %v1098_v6 }
 0x498   :  { %v3631_v22 = vunpack.c.l.bf16 %v1072_v54  ;;  %2776 = vrcp.f32 %v3599_v25  ;;  %v1142_v11 = vpack.c.bf16 %v2773_v30, %v2773_v30 }
 0x499   :  { %v2188_v9 = vsel %vm2108_vm6, %v2072_v63, %v2469_v16  ;;  %2778 = vpow2.f32 %v2141_v1 }
 0x49a   :  { %v2204_v33 = vpack.c.bf16 %v2188_v9, %v2188_v9  ;;  %1119 = vadd.xlane.f32.xlu0 %v3631_v22  ;;  %v1158_v41 = vunpack.c.l.bf16 %v1142_v11  ;;  %v2122_v9 = vmin.f32 %v3625_v42, 0.0 }
 0x49c   :  { %2239 = vrot.lane.b32.xlu1 %v2204_v33, %s2875_s2  ;;  %v1174_v20 = vmul.f32 %v1158_v41, %v3528_v61 }
 0x49d   :  { %v2775_v28 = vpop.eup %2774 }
 0x49e   :  { %v1141_v26 = vpack.c.bf16 %v2775_v28, %v2775_v28  ;;  %v1951_v12 = vpop.xlane.xlu0 %1950  ;;  %v1104_v17 = vpop.xlane.xlu1 %1103 }
 0x49f   :  { %v2777_v27 = vpop.eup %2776  ;;  %2780 = vrcp.f32 %v1951_v12 }
 0x4a0   :  { %v1157_v58 = vunpack.c.l.bf16 %v1141_v26  ;;  %2782 = vrcp.f32 %v1104_v17  ;;  %v2779_v35 = vpop.eup %2778  ;;  %v1986_v59 = vpack.c.bf16 %v2777_v27, %v2777_v27  ;;  %v2139_v27 = vmul.f32 1.442695, %v2122_v9 }
 0x4a1   :  { %v2468_v29 = vadd.f32 -1.0, %v2779_v35 }
 0x4a2   :  { %v1173_v25 = vmul.f32 %v1157_v58, %v3560_v48  ;;  %v2002_v43 = vunpack.c.l.bf16 %v1986_v59 }
 0x4a3   :  { %v2187_v47 = vsel %vm2107_vm7, %v2070_v55, %v2468_v29 }
 0x4a4   :  { %v1187_v24 = vpack.c.bf16 %v1174_v20, %v1173_v25  ;;  %v2018_v48 = vmul.f32 %v2002_v43, %v3524_v31  ;;  %v2203_v53 = vpack.c.bf16 %v2187_v47, %v2187_v47 }
 0x4a5   :  { %v2781_v3 = vpop.eup %2780 }
 0x4a6   :  { %v1987_v32 = vpack.c.bf16 %v2781_v3, %v2781_v3  ;;  %v1102_v23 = vpop.xlane.xlu0 %1101  ;;  %1219 = vmatmul.bf16.gmra.mxu1 %v1187_v24  ;;  %v974_v52 = vpop.xlane.xlu1 %973 }
 0x4a7   :  { %v2783_v36 = vpop.eup %2782  ;;  %2784 = vrcp.f32 %v1102_v23  ;;  %v991_v50 = vsub.f32 %v3579_v51, %v974_v52 }
 0x4a8   :  { %v2003_v46 = vunpack.c.l.bf16 %v1987_v32  ;;  %v1144_v45 = vpack.c.bf16 %v2783_v36, %v2783_v36  ;;  %2786 = vrcp.f32 %v3627_v19 }
 0x4a9   :  { %v1007_v38 = vpack.c.bf16 %v991_v50, %v991_v50 }
 0x4aa   :  { %v2019_v61 = vmul.f32 %v2003_v46, %v3564_v56  ;;  %v1160_v4 = vunpack.c.l.bf16 %v1144_v45 }
 0x4ab   :  { %v1023_v21 = vunpack.c.l.bf16 %v1007_v38 }
 0x4ac   :  { %v2029_v49 = vpack.c.bf16 %v2019_v61, %v2018_v48  ;;  %v1176_v19 = vmul.f32 %v1160_v4, %v3566_v57 }
 0x4ad   :  { %v2785_v63 = vpop.eup %2784  ;;  %v1053_v60 = vmul.f32 1.442695, %v1023_v21 }
 0x4ae   :  { %v1143_v10 = vpack.c.bf16 %v2785_v63, %v2785_v63  ;;  %v1955_v2 = vpop.xlane.xlu0 %1954  ;;  %v1108_v51 = vpop.xlane.xlu1 %1107  ;;  %2089 = vmatmul.bf16.gmra.mxu3 %v2029_v49  ;;  %2237 = vrot.lane.b32.xlu0 %v2203_v53, %s2875_s2 }
 0x4af   :  { %2788 = vpow2.f32 %v1053_v60  ;;  %v2787_v31 = vpop.eup %2786 }
 0x4b0   :  { %v1159_v55 = vunpack.c.l.bf16 %v1143_v10  ;;  %2790 = vrcp.f32 %v1955_v2  ;;  %v1988_v34 = vpack.c.bf16 %v2787_v31, %v2787_v31 }
 0x4b1   :  { %2792 = vrcp.f32 %v1108_v51 }
 0x4b2   :  { %v1175_v56 = vmul.f32 %v1159_v55, %v3576_v40  ;;  %v2004_v40 = vunpack.c.l.bf16 %v1988_v34 }
 0x4b4   :  { %v2075_v18 = vpop.f32.mrf.mxu3  ;;  %v1210_v0 = vpop.f32.mrf.mxu1  ;;  %v1188_v6 = vpack.c.bf16 %v1176_v19, %v1175_v56  ;;  %v2020_v59 = vmul.f32 %v2004_v40, %v3547_v62 }
 0x4b5   :  { %v2789_v54 = vpop.eup %2788  ;;  %v2125_v30 = vmin.f32 %v2075_v18, 0.0  ;;  %v1266_v16 = vmin.f32 %v1210_v0, 0.0  ;;  %vm2109_vm8 = vcmp.gt.f32.partialorder %v2075_v18, 0.0  ;;  %vm1250_vm9 = vcmp.gt.f32.partialorder %v1210_v0, 0.0 }
 0x4b6   :  { %v2791_v1 = vpop.eup %2790  ;;  %v1106_v11 = vpop.xlane.xlu0 %1105  ;;  %1224 = vmatmul.bf16.gmra.mxu1 %v1188_v6  ;;  %v1071_v33 = vpack.c.bf16 %v2789_v54, %v2789_v54 }
 0x4b7   :  { %v2793_v28 = vpop.eup %2792  ;;  %v1989_v41 = vpack.c.bf16 %v2791_v1, %v2791_v1  ;;  %v2145_v26 = vmul.f32 1.442695, %v2125_v30  ;;  %v1282_v12 = vmul.f32 1.442695, %v1266_v16  ;;  %2794 = vrcp.f32 %v1106_v11 }
 0x4b8   :  { %v3646_v57 = vunpack.c.l.bf16 %v1071_v33  ;;  %v1146_v58 = vpack.c.bf16 %v2793_v28, %v2793_v28 }
 0x4b9   :  { %v2005_v17 = vunpack.c.l.bf16 %v1989_v41  ;;  %2796 = vpow2.f32 %v2145_v26 }
 0x4ba   :  { %2798 = vpow2.f32 %v1282_v12  ;;  %1117 = vadd.xlane.f32.xlu2 %v3646_v57  ;;  %v1162_v29 = vunpack.c.l.bf16 %v1146_v58 }
 0x4bb   :  { %v2021_v35 = vmul.f32 %v2005_v17, %v3586_v37  ;;  %2800 = vpow2.f32 %v2139_v27 }
 0x4bc   :  { %v3651_v25 = vpop.f32.mrf.mxu3  ;;  %v1212_v20 = vpop.f32.mrf.mxu1  ;;  %v1178_v48 = vmul.f32 %v1162_v29, %v3588_v8 }
 0x4bd   :  { %v2795_v24 = vpop.eup %2794  ;;  %v1267_v3 = vmin.f32 %v1212_v20, 0.0  ;;  %v2030_v23 = vpack.c.bf16 %v2021_v35, %v2020_v59  ;;  %v2126_v50 = vmin.f32 %v3651_v25, 0.0  ;;  %vm1251_vm11 = vcmp.gt.f32.partialorder %v1212_v20, 0.0 }
 0x4be   :  { %v1145_v43 = vpack.c.bf16 %v2795_v24, %v2795_v24  ;;  %v1959_v32 = vpop.xlane.xlu0 %1958  ;;  %v1957_v52 = vpop.xlane.xlu2 %1956  ;;  %vm2110_vm14 = vcmp.gt.f32.partialorder %v3651_v25, 0.0 }
 0x4bf   :  { %v2797_v36 = vpop.eup %2796  ;;  %v1284_v46 = vmul.f32 1.442695, %v1267_v3  ;;  %2802 = vrcp.f32 %v1959_v32  ;;  %2094 = vmatmul.bf16.gmra.mxu3 %v2030_v23  ;;  %v2147_v49 = vmul.f32 1.442695, %v2126_v50 }
 0x4c0   :  { %v2799_v47 = vpop.eup %2798  ;;  %v2470_v37 = vadd.f32 -1.0, %v2797_v36  ;;  %v1161_v38 = vunpack.c.l.bf16 %v1145_v43  ;;  %2804 = vrcp.f32 %v1957_v52 }
 0x4c1   :  { %v2426_v62 = vadd.f32 -1.0, %v2799_v47  ;;  %2806 = vpow2.f32 %v1284_v46  ;;  %v2801_v63 = vpop.eup %2800 }
 0x4c2   :  { %v2189_v61 = vsel %vm2109_vm8, %v2075_v18, %v2470_v37  ;;  %v1177_v45 = vmul.f32 %v1161_v38, %v3595_v5  ;;  %2808 = vpow2.f32 %v2147_v49  ;;  %v2467_v18 = vadd.f32 -1.0, %v2801_v63 }
 0x4c3   :  { %v2205_v21 = vpack.c.bf16 %v2189_v61, %v2189_v61  ;;  %v1330_v53 = vsel %vm1250_vm9, %v1210_v0, %v2426_v62 }
 0x4c4   :  { %v1346_v60 = vpack.c.bf16 %v1330_v53, %v1330_v53  ;;  %v2080_v4 = vpop.f32.mrf.mxu3  ;;  %v1189_v10 = vpack.c.bf16 %v1178_v48, %v1177_v45  ;;  %v2186_v33 = vsel %vm2106_vm12, %v3625_v42, %v2467_v18 }
 0x4c5   :  { %v2803_v2 = vpop.eup %2802  ;;  %v2127_v51 = vmin.f32 %v2080_v4, 0.0  ;;  %2241 = vrot.lane.b32.xlu0 %v2205_v21, %s2875_s2  ;;  %v2202_v27 = vpack.c.bf16 %v2186_v33, %v2186_v33  ;;  %vm2111_vm13 = vcmp.gt.f32.partialorder %v2080_v4, 0.0 }
 0x4c6   :  { %v2805_v55 = vpop.eup %2804  ;;  %v1991_v31 = vpack.c.bf16 %v2803_v2, %v2803_v2  ;;  %1229 = vmatmul.bf16.gmra.mxu1 %v1189_v10  ;;  %1363 = vst.msk [vmem:[%s3814_s5] sm:$0xf] %vm1362_vm10, %v1346_v60 }
 0x4c7   :  { %v1990_v8 = vpack.c.bf16 %v2805_v55, %v2805_v55  ;;  %v2149_v5 = vmul.f32 1.442695, %v2127_v51  ;;  %v1112_v56 = vpop.xlane.xlu2 %1111  ;;  %v2807_v19 = vpop.eup %2806 }
 0x4c8   :  { %v2007_v34 = vunpack.c.l.bf16 %v1991_v31  ;;  %2810 = vrcp.f32 %v1112_v56  ;;  %v2427_v0 = vadd.f32 -1.0, %v2807_v19  ;;  %v2809_v11 = vpop.eup %2808 }
 0x4c9   :  { %v2006_v6 = vunpack.c.l.bf16 %v1990_v8  ;;  %2812 = vpow2.f32 %v2149_v5  ;;  %v2471_v58 = vadd.f32 -1.0, %v2809_v11 }
 0x4ca   :  { %v2023_v54 = vmul.f32 %v2007_v34, %v3601_v7  ;;  %v1331_v30 = vsel %vm1251_vm11, %v1212_v20, %v2427_v0 }
 0x4cb   :  { %v2022_v16 = vmul.f32 %v2006_v6, %v3603_v14  ;;  %v1347_v1 = vpack.c.bf16 %v1331_v30, %v1331_v30  ;;  %v2190_v3 = vsel %vm2110_vm14, %v3651_v25, %v2471_v58 }
 0x4cc   :  { %v2082_v9 = vpop.f32.mrf.mxu3  ;;  %v2206_v47 = vpack.c.bf16 %v2190_v3, %v2190_v3 }
 0x4cd   :  { %v2128_v28 = vmin.f32 %v2082_v9, 0.0  ;;  %v1215_v41 = vpop.f32.mrf.mxu1  ;;  %v2031_v26 = vpack.c.bf16 %v2023_v54, %v2022_v16  ;;  %1364 = vst.msk [vmem:[%s3814_s5 + $0x4] sm:$0xf] %vm1362_vm10, %v1347_v1  ;;  %vm2112_vm15 = vcmp.gt.f32.partialorder %v2082_v9, 0.0 }
 0x4ce   :  { %v2811_v12 = vpop.eup %2810  ;;  %v1268_v40 = vmin.f32 %v1215_v41, 0.0  ;;  %v1110_v17 = vpop.xlane.xlu1 %1109  ;;  %vm1252_vm0 = vcmp.gt.f32.partialorder %v1215_v41, 0.0 }
 0x4cf   :  { %v2813_v7 = vpop.eup %2812  ;;  %v2151_v14 = vmul.f32 1.442695, %v2128_v28  ;;  %2814 = vrcp.f32 %v1110_v17  ;;  %2099 = vmatmul.bf16.gmra.mxu3 %v2031_v26  ;;  %v1148_v20 = vpack.c.bf16 %v2811_v12, %v2811_v12 }
 0x4d0   :  { %v2472_v35 = vadd.f32 -1.0, %v2813_v7  ;;  %v1286_v59 = vmul.f32 1.442695, %v1268_v40 }
 0x4d1   :  { %2816 = vpow2.f32 %v2151_v14  ;;  %v1164_v52 = vunpack.c.l.bf16 %v1148_v20 }
 0x4d2   :  { %v2191_v42 = vsel %vm2111_vm13, %v2080_v4, %v2472_v35  ;;  %2818 = vpow2.f32 %v1286_v59  ;;  %2235 = vrot.lane.b32.xlu2 %v2202_v27, %s2875_s2 }
 0x4d3   :  { %v2207_v24 = vpack.c.bf16 %v2191_v42, %v2191_v42  ;;  %v1180_v21 = vmul.f32 %v1164_v52, %v3612_v39 }
 0x4d4   :  { %v2085_v29 = vpop.f32.mrf.mxu3 }
 0x4d5   :  { %v2815_v43 = vpop.eup %2814  ;;  %v2129_v32 = vmin.f32 %v2085_v29, 0.0  ;;  %v1217_v23 = vpop.f32.mrf.mxu1  ;;  %2245 = vrot.lane.b32.xlu1 %v2207_v24, %s2875_s2  ;;  %vm2113_vm1 = vcmp.gt.f32.partialorder %v2085_v29, 0.0 }
 0x4d6   :  { %v1147_v36 = vpack.c.bf16 %v2815_v43, %v2815_v43  ;;  %v1269_v50 = vmin.f32 %v1217_v23, 0.0  ;;  %vm1253_vm2 = vcmp.gt.f32.partialorder %v1217_v23, 0.0 }
 0x4d7   :  { %v2817_v46 = vpop.eup %2816  ;;  %v2153_v37 = vmul.f32 1.442695, %v2129_v32  ;;  %v1116_v38 = vpop.xlane.xlu1 %1115 }
 0x4d8   :  { %v2819_v62 = vpop.eup %2818  ;;  %v2473_v48 = vadd.f32 -1.0, %v2817_v46  ;;  %v1163_v61 = vunpack.c.l.bf16 %v1147_v36  ;;  %v1288_v45 = vmul.f32 1.442695, %v1269_v50  ;;  %2820 = vrcp.f32 %v1116_v38 }
 0x4d9   :  { %v2428_v25 = vadd.f32 -1.0, %v2819_v62  ;;  %2822 = vpow2.f32 %v2153_v37 }
 0x4da   :  { %v2192_v53 = vsel %vm2112_vm15, %v2082_v9, %v2473_v48  ;;  %v1179_v49 = vmul.f32 %v1163_v61, %v3616_v13  ;;  %2824 = vpow2.f32 %v1288_v45  ;;  %2243 = vrot.lane.b32.xlu2 %v2206_v47, %s2875_s2 }
 0x4db   :  { %v2208_v63 = vpack.c.bf16 %v2192_v53, %v2192_v53  ;;  %v1332_v60 = vsel %vm1252_vm0, %v1215_v41, %v2428_v25 }
 0x4dc   :  { %v1348_v4 = vpack.c.bf16 %v1332_v60, %v1332_v60  ;;  %v2087_v10 = vpop.f32.mrf.mxu3  ;;  %v1190_v2 = vpack.c.bf16 %v1180_v21, %v1179_v49 }
 0x4dd   :  { %v2130_v51 = vmin.f32 %v2087_v10, 0.0  ;;  %2247 = vrot.lane.b32.xlu0 %v2208_v63, %s2875_s2  ;;  %vm2114_vm3 = vcmp.gt.f32.partialorder %v2087_v10, 0.0 }
 0x4de   :  { %v2821_v55 = vpop.eup %2820  ;;  %v1114_v31 = vpop.xlane.xlu0 %1113  ;;  %1234 = vmatmul.bf16.gmra.mxu1 %v1190_v2  ;;  %1365 = vst.msk [vmem:[%s3814_s5 + $0x8] sm:$0xf] %vm1362_vm10, %v1348_v4 }
 0x4df   :  { %v2823_v39 = vpop.eup %2822  ;;  %v2155_v13 = vmul.f32 1.442695, %v2130_v51  ;;  %2826 = vrcp.f32 %v1114_v31  ;;  %v1150_v34 = vpack.c.bf16 %v2821_v55, %v2821_v55 }
 0x4e0   :  { %v2825_v8 = vpop.eup %2824  ;;  %v2474_v5 = vadd.f32 -1.0, %v2823_v39 }
 0x4e1   :  { %v2429_v56 = vadd.f32 -1.0, %v2825_v8  ;;  %2828 = vpow2.f32 %v2155_v13  ;;  %v1166_v30 = vunpack.c.l.bf16 %v1150_v34 }
 0x4e2   :  { %v2193_v19 = vsel %vm2113_vm1, %v2085_v29, %v2474_v5 }
 0x4e3   :  { %v2209_v18 = vpack.c.bf16 %v2193_v19, %v2193_v19  ;;  %v1333_v0 = vsel %vm1253_vm2, %v1217_v23, %v2429_v56  ;;  %v1182_v33 = vmul.f32 %v1166_v30, %v3619_v15 }
 0x4e4   :  { %v1349_v6 = vpack.c.bf16 %v1333_v0, %v1333_v0 }
 0x4e5   :  { %v2827_v54 = vpop.eup %2826  ;;  %2249 = vrot.lane.b32.xlu2 %v2209_v18, %s2875_s2 }
 0x4e6   :  { %v1149_v16 = vpack.c.bf16 %v2827_v54, %v2827_v54  ;;  %1366 = vst.msk [vmem:[%s3814_s5 + $0xc] sm:$0xf] %vm1362_vm10, %v1349_v6 }
 0x4e7   :  { %v2829_v1 = vpop.eup %2828 }
 0x4e8   :  { %v2475_v9 = vadd.f32 -1.0, %v2829_v1  ;;  %v1165_v11 = vunpack.c.l.bf16 %v1149_v16 }
 0x4ea   :  { %v2194_v28 = vsel %vm2114_vm3, %v2087_v10, %v2475_v9  ;;  %v1181_v41 = vmul.f32 %v1165_v11, %v3622_v44 }
 0x4eb   :  { %v2210_v26 = vpack.c.bf16 %v2194_v28, %v2194_v28 }
 0x4ec   :  { %v1191_v12 = vpack.c.bf16 %v1182_v33, %v1181_v41 }
 0x4ed   :  { %2251 = vrot.lane.b32.xlu1 %v2210_v26, %s2875_s2 }
 0x4ee   :  { %1239 = vmatmul.bf16.gmra.mxu1 %v1191_v12 }
 0x4f2   :  { %v2234_v40 = vpop.permute.xlu1 %2233 }
 0x4f3   :  { %2282 = vst.msk [vmem:[%s3814_s5] sm:$0xf] %vm2281_vm4, %v2234_v40 }
 0x50d   :  { %v1120_v15 = vpop.xlane.xlu0 %1119 }
 0x50e   :  { %v2240_v17 = vpop.permute.xlu1 %2239  ;;  %2830 = vrcp.f32 %v1120_v15 }
 0x50f   :  { %2285 = vst.msk [vmem:[%s3814_s5 + $0xc] sm:$0xf] %vm2281_vm4, %v2240_v17 }
 0x514   :  { %v2831_v59 = vpop.eup %2830 }
 0x515   :  { %v1152_v29 = vpack.c.bf16 %v2831_v59, %v2831_v59 }
 0x517   :  { %v1168_v37 = vunpack.c.l.bf16 %v1152_v29 }
 0x519   :  { %v1184_v53 = vmul.f32 %v1168_v37, %v3631_v22 }
 0x520   :  { %v2238_v44 = vpop.permute.xlu0 %2237 }
 0x521   :  { %2284 = vst.msk [vmem:[%s3814_s5 + $0x8] sm:$0xf] %vm2281_vm4, %v2238_v44 }
 0x523   :  { %v1220_v7 = vpop.f32.mrf.mxu1 }
 0x524   :  { %v1270_v14 = vmin.f32 %v1220_v7, 0.0  ;;  %vm1254_vm5 = vcmp.gt.f32.partialorder %v1220_v7, 0.0 }
 0x526   :  { %v1290_v27 = vmul.f32 1.442695, %v1270_v14 }
 0x528   :  { %2832 = vpow2.f32 %v1290_v27 }
 0x52b   :  { %v1222_v58 = vpop.f32.mrf.mxu1 }
 0x52c   :  { %v1271_v35 = vmin.f32 %v1222_v58, 0.0  ;;  %vm1255_vm6 = vcmp.gt.f32.partialorder %v1222_v58, 0.0 }
 0x52d   :  { %v1118_v42 = vpop.xlane.xlu2 %1117 }
 0x52e   :  { %v2833_v20 = vpop.eup %2832  ;;  %v1292_v24 = vmul.f32 1.442695, %v1271_v35  ;;  %2834 = vrcp.f32 %v1118_v42 }
 0x52f   :  { %v2430_v3 = vadd.f32 -1.0, %v2833_v20 }
 0x530   :  { %2836 = vpow2.f32 %v1292_v24 }
 0x531   :  { %v1334_v43 = vsel %vm1254_vm5, %v1220_v7, %v2430_v3  ;;  %v2090_v32 = vpop.f32.mrf.mxu3 }
 0x532   :  { %v1350_v23 = vpack.c.bf16 %v1334_v43, %v1334_v43  ;;  %v2131_v52 = vmin.f32 %v2090_v32, 0.0  ;;  %vm2115_vm7 = vcmp.gt.f32.partialorder %v2090_v32, 0.0 }
 0x533   :  { %v1225_v36 = vpop.f32.mrf.mxu1 }
 0x534   :  { %v2835_v50 = vpop.eup %2834  ;;  %1367 = vst.msk [vmem:[%s3814_s5 + $0x10] sm:$0xf] %vm1362_vm10, %v1350_v23  ;;  %v2157_v46 = vmul.f32 1.442695, %v2131_v52  ;;  %v1272_v47 = vmin.f32 %v1225_v36, 0.0  ;;  %vm1256_vm8 = vcmp.gt.f32.partialorder %v1225_v36, 0.0 }
 0x535   :  { %v1151_v38 = vpack.c.bf16 %v2835_v50, %v2835_v50  ;;  %v2236_v62 = vpop.permute.xlu2 %2235 }
 0x536   :  { %v2837_v48 = vpop.eup %2836  ;;  %2838 = vpow2.f32 %v2157_v46  ;;  %v1294_v61 = vmul.f32 1.442695, %v1272_v47  ;;  %2283 = vst.msk [vmem:[%s3814_s5 + $0x4] sm:$0xf] %vm2281_vm4, %v2236_v62 }
 0x537   :  { %v2431_v45 = vadd.f32 -1.0, %v2837_v48  ;;  %v1167_v25 = vunpack.c.l.bf16 %v1151_v38  ;;  %v2242_v21 = vpop.permute.xlu0 %2241 }
 0x538   :  { %2840 = vpow2.f32 %v1294_v61  ;;  %2286 = vst.msk [vmem:[%s3814_s5 + $0x10] sm:$0xf] %vm2281_vm4, %v2242_v21 }
 0x539   :  { %v1335_v49 = vsel %vm1255_vm6, %v1222_v58, %v2431_v45  ;;  %v1183_v63 = vmul.f32 %v1167_v25, %v3646_v57  ;;  %v2092_v60 = vpop.f32.mrf.mxu3 }
 0x53a   :  { %v1351_v4 = vpack.c.bf16 %v1335_v49, %v1335_v49  ;;  %v2132_v10 = vmin.f32 %v2092_v60, 0.0  ;;  %vm2116_vm9 = vcmp.gt.f32.partialorder %v2092_v60, 0.0 }
 0x53b   :  { %v1227_v2 = vpop.f32.mrf.mxu1  ;;  %v1192_v51 = vpack.c.bf16 %v1184_v53, %v1183_v63 }
 0x53c   :  { %v2839_v55 = vpop.eup %2838  ;;  %1368 = vst.msk [vmem:[%s3814_s5 + $0x14] sm:$0xf] %vm1362_vm10, %v1351_v4  ;;  %v2159_v31 = vmul.f32 1.442695, %v2132_v10  ;;  %v1273_v39 = vmin.f32 %v1227_v2, 0.0  ;;  %vm1257_vm11 = vcmp.gt.f32.partialorder %v1227_v2, 0.0 }
 0x53d   :  { %v2476_v13 = vadd.f32 -1.0, %v2839_v55  ;;  %1244 = vmatmul.bf16.gmra.mxu1 %v1192_v51  ;;  %v2244_v8 = vpop.permute.xlu2 %2243 }
 0x53e   :  { %v2841_v22 = vpop.eup %2840  ;;  %2842 = vpow2.f32 %v2159_v31  ;;  %v1296_v57 = vmul.f32 1.442695, %v1273_v39  ;;  %2287 = vst.msk [vmem:[%s3814_s5 + $0x14] sm:$0xf] %vm2281_vm4, %v2244_v8 }
 0x53f   :  { %v2195_v5 = vsel %vm2115_vm7, %v2090_v32, %v2476_v13  ;;  %v2432_v56 = vadd.f32 -1.0, %v2841_v22 }
 0x540   :  { %v2211_v19 = vpack.c.bf16 %v2195_v5, %v2195_v5  ;;  %2844 = vpow2.f32 %v1296_v57 }
 0x541   :  { %v1336_v34 = vsel %vm1256_vm8, %v1225_v36, %v2432_v56 }
 0x542   :  { %v1352_v18 = vpack.c.bf16 %v1336_v34, %v1336_v34  ;;  %2253 = vrot.lane.b32.xlu0 %v2211_v19, %s2875_s2  ;;  %v2095_v0 = vpop.f32.mrf.mxu3 }
 0x543   :  { %v1230_v6 = vpop.f32.mrf.mxu1  ;;  %v2133_v30 = vmin.f32 %v2095_v0, 0.0  ;;  %vm2117_vm12 = vcmp.gt.f32.partialorder %v2095_v0, 0.0 }
 0x544   :  { %v2843_v54 = vpop.eup %2842  ;;  %1369 = vst.msk [vmem:[%s3814_s5 + $0x18] sm:$0xf] %vm1362_vm10, %v1352_v18  ;;  %v1274_v16 = vmin.f32 %v1230_v6, 0.0  ;;  %vm1258_vm13 = vcmp.gt.f32.partialorder %v1230_v6, 0.0 }
 0x545   :  { %v2477_v1 = vadd.f32 -1.0, %v2843_v54  ;;  %v2161_v11 = vmul.f32 1.442695, %v2133_v30  ;;  %v2250_v36 = vpop.permute.xlu2 %2249 }
 0x546   :  { %v2845_v9 = vpop.eup %2844  ;;  %v1298_v33 = vmul.f32 1.442695, %v1274_v16 }
 0x547   :  { %v2196_v28 = vsel %vm2116_vm9, %v2092_v60, %v2477_v1  ;;  %v2433_v41 = vadd.f32 -1.0, %v2845_v9  ;;  %v2246_v26 = vpop.permute.xlu1 %2245  ;;  %2846 = vpow2.f32 %v2161_v11 }
 0x548   :  { %v2212_v12 = vpack.c.bf16 %v2196_v28, %v2196_v28  ;;  %2288 = vst.msk [vmem:[%s3814_s5 + $0x18] sm:$0xf] %vm2281_vm4, %v2246_v26  ;;  %2848 = vpow2.f32 %v1298_v33 }
 0x549   :  { %v1337_v40 = vsel %vm1257_vm11, %v1227_v2, %v2433_v41 }
 0x54a   :  { %v1353_v17 = vpack.c.bf16 %v1337_v40, %v1337_v40  ;;  %2255 = vrot.lane.b32.xlu2 %v2212_v12, %s2875_s2  ;;  %v2097_v15 = vpop.f32.mrf.mxu3 }
 0x54b   :  { %v1232_v44 = vpop.f32.mrf.mxu1  ;;  %v2134_v7 = vmin.f32 %v2097_v15, 0.0  ;;  %vm2118_vm14 = vcmp.gt.f32.partialorder %v2097_v15, 0.0 }
 0x54c   :  { %1370 = vst.msk [vmem:[%s3814_s5 + $0x1c] sm:$0xf] %vm1362_vm10, %v1353_v17  ;;  %v1275_v14 = vmin.f32 %v1232_v44, 0.0  ;;  %vm1259_vm15 = vcmp.gt.f32.partialorder %v1232_v44, 0.0 }
 0x54d   :  { %v2847_v27 = vpop.eup %2846  ;;  %v2163_v58 = vmul.f32 1.442695, %v2134_v7 }
 0x54e   :  { %v1300_v35 = vmul.f32 1.442695, %v1275_v14  ;;  %v2849_v59 = vpop.eup %2848  ;;  %v2478_v42 = vadd.f32 -1.0, %v2847_v27 }
 0x54f   :  { %v2248_v20 = vpop.permute.xlu0 %2247  ;;  %v2434_v24 = vadd.f32 -1.0, %v2849_v59  ;;  %2850 = vpow2.f32 %v2163_v58 }
 0x550   :  { %2289 = vst.msk [vmem:[%s3814_s5 + $0x1c] sm:$0xf] %vm2281_vm4, %v2248_v20  ;;  %v2197_v3 = vsel %vm2117_vm12, %v2095_v0, %v2478_v42  ;;  %2852 = vpow2.f32 %v1300_v35 }
 0x551   :  { %v2213_v29 = vpack.c.bf16 %v2197_v3, %v2197_v3  ;;  %v1338_v43 = vsel %vm1258_vm13, %v1230_v6, %v2434_v24 }
 0x552   :  { %v1354_v32 = vpack.c.bf16 %v1338_v43, %v1338_v43  ;;  %v2100_v23 = vpop.f32.mrf.mxu3 }
 0x553   :  { %v2135_v52 = vmin.f32 %v2100_v23, 0.0  ;;  %2257 = vrot.lane.b32.xlu1 %v2213_v29, %s2875_s2  ;;  %vm2119_vm0 = vcmp.gt.f32.partialorder %v2100_v23, 0.0 }
 0x554   :  { %1371 = vst.msk [vmem:[%s3814_s5 + $0x20] sm:$0xf] %vm1362_vm10, %v1354_v32 }
 0x555   :  { %v2851_v50 = vpop.eup %2850  ;;  %2290 = vst.msk [vmem:[%s3814_s5 + $0x20] sm:$0xf] %vm2281_vm4, %v2250_v36  ;;  %v2165_v46 = vmul.f32 1.442695, %v2135_v52 }
 0x556   :  { %v2853_v47 = vpop.eup %2852  ;;  %v2479_v37 = vadd.f32 -1.0, %v2851_v50 }
 0x557   :  { %v2435_v38 = vadd.f32 -1.0, %v2853_v47  ;;  %2854 = vpow2.f32 %v2165_v46 }
 0x558   :  { %v2198_v62 = vsel %vm2118_vm14, %v2097_v15, %v2479_v37 }
 0x559   :  { %v2214_v48 = vpack.c.bf16 %v2198_v62, %v2198_v62  ;;  %v1339_v61 = vsel %vm1259_vm15, %v1232_v44, %v2435_v38 }
 0x55a   :  { %v1355_v45 = vpack.c.bf16 %v1339_v61, %v1339_v61  ;;  %v2102_v25 = vpop.f32.mrf.mxu3 }
 0x55b   :  { %v1235_v21 = vpop.f32.mrf.mxu1  ;;  %v2136_v53 = vmin.f32 %v2102_v25, 0.0  ;;  %2259 = vrot.lane.b32.xlu0 %v2214_v48, %s2875_s2  ;;  %vm2120_vm1 = vcmp.gt.f32.partialorder %v2102_v25, 0.0 }
 0x55c   :  { %v1276_v49 = vmin.f32 %v1235_v21, 0.0  ;;  %1372 = vst.msk [vmem:[%s3814_s5 + $0x24] sm:$0xf] %vm1362_vm10, %v1355_v45  ;;  %vm1260_vm2 = vcmp.gt.f32.partialorder %v1235_v21, 0.0 }
 0x55d   :  { %v2855_v63 = vpop.eup %2854  ;;  %v2167_v60 = vmul.f32 1.442695, %v2136_v53 }
 0x55e   :  { %v1302_v4 = vmul.f32 1.442695, %v1276_v49  ;;  %v2480_v10 = vadd.f32 -1.0, %v2855_v63 }
 0x55f   :  { %v2252_v2 = vpop.permute.xlu1 %2251  ;;  %2856 = vpow2.f32 %v2167_v60 }
 0x560   :  { %2291 = vst.msk [vmem:[%s3814_s5 + $0x24] sm:$0xf] %vm2281_vm4, %v2252_v2  ;;  %v2199_v51 = vsel %vm2119_vm0, %v2100_v23, %v2480_v10  ;;  %2858 = vpow2.f32 %v1302_v4 }
 0x561   :  { %v2215_v55 = vpack.c.bf16 %v2199_v51, %v2199_v51 }
 0x563   :  { %v1237_v31 = vpop.f32.mrf.mxu1  ;;  %2261 = vrot.lane.b32.xlu2 %v2215_v55, %s2875_s2 }
 0x564   :  { %v1277_v39 = vmin.f32 %v1237_v31, 0.0  ;;  %vm1261_vm3 = vcmp.gt.f32.partialorder %v1237_v31, 0.0 }
 0x565   :  { %v2857_v13 = vpop.eup %2856 }
 0x566   :  { %v1304_v8 = vmul.f32 1.442695, %v1277_v39  ;;  %v2859_v22 = vpop.eup %2858  ;;  %v2481_v57 = vadd.f32 -1.0, %v2857_v13 }
 0x567   :  { %v2436_v5 = vadd.f32 -1.0, %v2859_v22 }
 0x568   :  { %2860 = vpow2.f32 %v1304_v8  ;;  %v2200_v56 = vsel %vm2120_vm1, %v2102_v25, %v2481_v57 }
 0x569   :  { %v2216_v19 = vpack.c.bf16 %v2200_v56, %v2200_v56  ;;  %v1340_v34 = vsel %vm1260_vm2, %v1235_v21, %v2436_v5 }
 0x56a   :  { %v1356_v18 = vpack.c.bf16 %v1340_v34, %v1340_v34 }
 0x56b   :  { %v1240_v0 = vpop.f32.mrf.mxu1  ;;  %2263 = vrot.lane.b32.xlu1 %v2216_v19, %s2875_s2 }
 0x56c   :  { %v1278_v6 = vmin.f32 %v1240_v0, 0.0  ;;  %1373 = vst.msk [vmem:[%s3814_s5 + $0x28] sm:$0xf] %vm1362_vm10, %v1356_v18  ;;  %vm1262_vm5 = vcmp.gt.f32.partialorder %v1240_v0, 0.0 }
 0x56e   :  { %v2861_v54 = vpop.eup %2860  ;;  %v1306_v30 = vmul.f32 1.442695, %v1278_v6 }
 0x56f   :  { %v2437_v16 = vadd.f32 -1.0, %v2861_v54 }
 0x570   :  { %2862 = vpow2.f32 %v1306_v30 }
 0x571   :  { %v1341_v1 = vsel %vm1261_vm3, %v1237_v31, %v2437_v16 }
 0x572   :  { %v1357_v9 = vpack.c.bf16 %v1341_v1, %v1341_v1 }
 0x573   :  { %v1242_v11 = vpop.f32.mrf.mxu1 }
 0x574   :  { %1374 = vst.msk [vmem:[%s3814_s5 + $0x2c] sm:$0xf] %vm1362_vm10, %v1357_v9  ;;  %v1279_v33 = vmin.f32 %v1242_v11, 0.0  ;;  %vm1263_vm6 = vcmp.gt.f32.partialorder %v1242_v11, 0.0 }
 0x576   :  { %v2863_v28 = vpop.eup %2862  ;;  %v1308_v41 = vmul.f32 1.442695, %v1279_v33 }
 0x577   :  { %v2438_v26 = vadd.f32 -1.0, %v2863_v28 }
 0x578   :  { %2864 = vpow2.f32 %v1308_v41 }
 0x579   :  { %v1342_v12 = vsel %vm1262_vm5, %v1240_v0, %v2438_v26 }
 0x57a   :  { %v1358_v40 = vpack.c.bf16 %v1342_v12, %v1342_v12 }
 0x57c   :  { %1375 = vst.msk [vmem:[%s3814_s5 + $0x30] sm:$0xf] %vm1362_vm10, %v1358_v40 }
 0x57e   :  { %v2865_v17 = vpop.eup %2864 }
 0x57f   :  { %v2439_v15 = vadd.f32 -1.0, %v2865_v17 }
 0x581   :  { %v1343_v44 = vsel %vm1263_vm6, %v1242_v11, %v2439_v15 }
 0x582   :  { %v1359_v7 = vpack.c.bf16 %v1343_v44, %v1343_v44 }
 0x584   :  { %1376 = vst.msk [vmem:[%s3814_s5 + $0x34] sm:$0xf] %vm1362_vm10, %v1359_v7 }
 0x5a4   :  { %v2256_v14 = vpop.permute.xlu2 %2255 }
 0x5a5   :  { %2293 = vst.msk [vmem:[%s3814_s5 + $0x2c] sm:$0xf] %vm2281_vm4, %v2256_v14 }
 0x5b4   :  { %v2254_v27 = vpop.permute.xlu0 %2253 }
 0x5b5   :  { %2292 = vst.msk [vmem:[%s3814_s5 + $0x28] sm:$0xf] %vm2281_vm4, %v2254_v27 }
 0x5ba   :  { %v1245_v58 = vpop.f32.mrf.mxu1 }
 0x5bb   :  { %v1280_v35 = vmin.f32 %v1245_v58, 0.0  ;;  %vm1264_vm7 = vcmp.gt.f32.partialorder %v1245_v58, 0.0 }
 0x5bd   :  { %v1310_v59 = vmul.f32 1.442695, %v1280_v35  ;;  %v2262_v52 = vpop.permute.xlu2 %2261 }
 0x5bf   :  { %2866 = vpow2.f32 %v1310_v59 }
 0x5c2   :  { %v1247_v42 = vpop.f32.mrf.mxu1 }
 0x5c3   :  { %v1281_v20 = vmin.f32 %v1247_v42, 0.0  ;;  %vm1265_vm8 = vcmp.gt.f32.partialorder %v1247_v42, 0.0 }
 0x5c5   :  { %v2867_v24 = vpop.eup %2866  ;;  %v1312_v3 = vmul.f32 1.442695, %v1281_v20  ;;  %v2258_v43 = vpop.permute.xlu1 %2257 }
 0x5c6   :  { %v2440_v29 = vadd.f32 -1.0, %v2867_v24  ;;  %2294 = vst.msk [vmem:[%s3814_s5 + $0x30] sm:$0xf] %vm2281_vm4, %v2258_v43 }
 0x5c7   :  { %2868 = vpow2.f32 %v1312_v3 }
 0x5c8   :  { %v1344_v32 = vsel %vm1264_vm7, %v1245_v58, %v2440_v29 }
 0x5c9   :  { %v1360_v23 = vpack.c.bf16 %v1344_v32, %v1344_v32 }
 0x5cb   :  { %1377 = vst.msk [vmem:[%s3814_s5 + $0x38] sm:$0xf] %vm1362_vm10, %v1360_v23 }
 0x5cc   :  { %2296 = vst.msk [vmem:[%s3814_s5 + $0x38] sm:$0xf] %vm2281_vm4, %v2262_v52 }
 0x5cd   :  { %v2869_v36 = vpop.eup %2868  ;;  %v2260_v46 = vpop.permute.xlu0 %2259 }
 0x5ce   :  { %v2441_v50 = vadd.f32 -1.0, %v2869_v36  ;;  %2295 = vst.msk [vmem:[%s3814_s5 + $0x34] sm:$0xf] %vm2281_vm4, %v2260_v46 }
 0x5d0   :  { %v1345_v47 = vsel %vm1265_vm8, %v1247_v42, %v2441_v50 }
 0x5d1   :  { %v1361_v37 = vpack.c.bf16 %v1345_v47, %v1345_v47 }
 0x5d3   :  { %1378 = vst.msk [vmem:[%s3814_s5 + $0x3c] sm:$0xf] %vm1362_vm10, %v1361_v37 }
 0x5dd   :  { %v2264_v38 = vpop.permute.xlu1 %2263 }
 0x5de   :  { %2297 = vst.msk [vmem:[%s3814_s5 + $0x3c] sm:$0xf] %vm2281_vm4, %v2264_v38 }

</bundles_post_ra>
